<compile_context>
chip_gen: v6e
topology: v6e:2x2x1
jax: 0.10.0
libtpu: 0.0.40
codegen_flags: <defaults>
</compile_context>

<pallas_src>
import jax
import jax.numpy as jnp
import numpy as np
from jax.experimental import pallas as pl
from jax.experimental.pallas import tpu as pltpu

# ----------------------------- small config ---------------------------------
IN_DIM = 32      # conditional feature channels (c)
OUT_DIM = 16     # target feature channels (x) == output channels
LAYERS = 4
STACKS = 1
RES_CH = 16      # residual_channels
GATE_CH = 32     # gate_channels
SKIP_CH = 16     # skip_out_channels
KSIZE = 3
B = 2
T = 16

LAYERS_PER_STACK = LAYERS // STACKS
DILATIONS = tuple(2 ** (layer % LAYERS_PER_STACK) for layer in range(LAYERS))
GATE_HALF = GATE_CH // 2
FUSED_IN = KSIZE * RES_CH + IN_DIM     # 80: [tap0 | tap1 | tap2 | cond] rows
SO_CH = SKIP_CH + RES_CH               # 32: [skip | out] lanes


# ------------------------------- kernel -------------------------------------
def wavenet_kernel(c_ref, x_ref,
                   fc_w_ref, fc_b_ref,
                   gate_w_ref, gate_b_ref,
                   so_w_ref, so_b_ref,
                   l1_w_ref, l1_b_ref, l2_w_ref, l2_b_ref,
                   o_ref):
    x = x_ref[...]                      # (rows, OUT_DIM) f32
    c = c_ref[...]                      # (rows, IN_DIM)  f32
    rows = x.shape[0]                   # batch_block * T

    # per-segment (length-T) time index, for causal masking across the folded
    # batch boundary; hoisted out of the layer loop.
    local_t = jax.lax.broadcasted_iota(jnp.int32, (rows, 1), 0) % T
    shift_set = sorted({(KSIZE - 1 - k) * DILATIONS[l]
                        for l in range(LAYERS) for k in range(KSIZE)} - {0})
    keep = {s: local_t >= s for s in shift_set if s < T}

    def mm(a, w):
        # bf16 operands, f32 accumulation on the MXU
        return jnp.dot(a.astype(jnp.bfloat16), w,
                       preferred_element_type=jnp.float32)

    # first_conv: Conv1d1x1(out_dim -> residual_channels)
    h = mm(x, fc_w_ref[...]) + fc_b_ref[...]          # (rows, RES_CH) f32

    skips = jnp.zeros((rows, SKIP_CH), jnp.float32)

    for layer in range(LAYERS):
        d = DILATIONS[layer]
        residual = h

        # shifted copies of h for every tap of the causal dilated conv
        pieces = []
        for k in range(KSIZE):
            s = (KSIZE - 1 - k) * d
            if s == 0:
                pieces.append(h)
            elif s >= T:
                # dead tap: always reads the causal zero left-padding
                pieces.append(jnp.zeros_like(h))
            else:
                shifted = jnp.concatenate(
                    [jnp.zeros((s, RES_CH), jnp.float32), h[:rows - s, :]],
                    axis=0)
                pieces.append(jnp.where(keep[s], shifted, 0.0))
        pieces.append(c)
        xs_cat = jnp.concatenate(pieces, axis=-1)     # (rows, FUSED_IN) f32

        # fused: dilated conv (all K taps) + local conditioning, one matmul
        gate_in = mm(xs_cat, gate_w_ref[layer]) + gate_b_ref[layer]
        a = gate_in[:, :GATE_HALF]
        b = gate_in[:, GATE_HALF:]
        g = jnp.tanh(a) * jax.nn.sigmoid(b)           # gating stays f32

        # fused skip / out 1x1 convs, lane-split result
        so = mm(g, so_w_ref[layer]) + so_b_ref[layer]
        skips = skips + so[:, :SKIP_CH]
        h = so[:, SKIP_CH:] + residual

    # last_conv_layers: ReLU -> 1x1 -> ReLU -> 1x1
    y = jnp.maximum(skips, 0.0)
    y = mm(y, l1_w_ref[...]) + l1_b_ref[...]
    y = jnp.maximum(y, 0.0)
    y = mm(y, l2_w_ref[...]) + l2_b_ref[...]

    # TODO(synk): for production sizes, pad OUT_DIM to a 128-multiple in l2_w
    # (lane-dense unmasked stores) and slice wrapper-side.
    o_ref[...] = y.astype(o_ref.dtype)


# --------------------------- host-side weight packing ------------------------
WEIGHT_NAMES = ("fc_w", "fc_b", "gate_w", "gate_b", "so_w", "so_b",
                "l1_w", "l1_b", "l2_w", "l2_b")


def pack_params(p):
    """Fuse per-layer weights into the layouts the kernel expects.

    gate_w rows = [conv tap0 ; tap1 ; tap2 ; cond] along Cin, so one matmul of
    concat([h<<2d, h<<d, h, c]) reproduces the dilated conv plus the bias-free
    conditioning 1x1.  so_w lanes = [skip_w | out_w].  Matmul weights stored in
    bf16 (f32 accumulation in the kernel); biases stay f32.
    """
    gate_w = jnp.concatenate(
        [p["conv_w"].reshape(LAYERS, KSIZE * RES_CH, GATE_CH), p["cond_w"]],
        axis=1)                                        # (LAYERS, FUSED_IN, GATE_CH)
    so_w = jnp.concatenate([p["skip_w"], p["out_w"]], axis=2)   # (LAYERS, GATE_HALF, SO_CH)
    so_b = jnp.concatenate([p["skip_b"], p["out_b"]], axis=2)   # (LAYERS, 1, SO_CH)
    bf16, f32 = jnp.bfloat16, jnp.float32
    return {
        "fc_w": p["fc_w"].astype(bf16), "fc_b": p["fc_b"].astype(f32),
        "gate_w": gate_w.astype(bf16), "gate_b": p["conv_b"].astype(f32),
        "so_w": so_w.astype(bf16), "so_b": so_b.astype(f32),
        "l1_w": p["l1_w"].astype(bf16), "l1_b": p["l1_b"].astype(f32),
        "l2_w": p["l2_w"].astype(bf16), "l2_b": p["l2_b"].astype(f32),
    }


def _default_batch_block(batch):
    """Fold the whole batch into sublanes on single-TC chips (v5e/v6e); keep
    >= 2 parallel grid steps on chips whose program spans 2 TensorCores
    (v3/v4/v5p megacore, v7x)."""
    kind = ""
    try:
        kind = jax.devices()[0].device_kind.lower()
    except Exception:
        pass
    multi_tc = any(tag in kind for tag in ("v3", "v4", "v5p", "7"))
    if multi_tc and batch % 2 == 0:
        return batch // 2
    return batch


# ------------------------------- wrapper -------------------------------------
def wavenet_forward(c, x, params, batch_block=None):
    """c: (B, T, IN_DIM), x: (B, T, OUT_DIM) -> (B, T, OUT_DIM)"""
    batch, t_len, _ = c.shape
    assert t_len == T
    if batch_block is None:
        batch_block = _default_batch_block(batch)
    if batch % batch_block != 0:
        batch_block = batch
    steps = batch // batch_block
    rows = batch_block * T                     # sublane rows per grid step

    packed = pack_params(params)
    weights = [packed[k] for k in WEIGHT_NAMES]

    # fold batch into the sublane/time axis (weights are shared across batch)
    c2 = c.reshape(batch * T, IN_DIM)
    x2 = x.reshape(batch * T, OUT_DIM)

    def _full_spec(arr):
        nd = arr.ndim
        return pl.BlockSpec(arr.shape, lambda i, _nd=nd: (0,) * _nd)

    in_specs = ([pl.BlockSpec((rows, IN_DIM), lambda i: (i, 0)),
                 pl.BlockSpec((rows, OUT_DIM), lambda i: (i, 0))]
                + [_full_spec(w) for w in weights])
    out_spec = pl.BlockSpec((rows, OUT_DIM), lambda i: (i, 0))

    # TODO(synk): at production T, tile the time axis with a grid dimension and
    # carry a (KSIZE-1)*max_dilation causal halo of h per layer in VMEM scratch.
    out = pl.pallas_call(
        wavenet_kernel,
        out_shape=jax.ShapeDtypeStruct((batch * T, OUT_DIM), jnp.float32),
        grid_spec=pltpu.PrefetchScalarGridSpec(
            num_scalar_prefetch=0,
            grid=(steps,),
            in_specs=in_specs,
            out_specs=out_spec,
        ),
        compiler_params=pltpu.CompilerParams(
            dimension_semantics=("parallel",)),
    )(c2, x2, *weights)
    return out.reshape(batch, T, OUT_DIM)


# --------------------------- reference (plain JAX) ----------------------------
def _mm(a, w):
    # same numerics as the kernel: bf16 operands, f32 accumulation
    return jnp.einsum("btc,cd->btd", a.astype(jnp.bfloat16),
                      w.astype(jnp.bfloat16),
                      preferred_element_type=jnp.float32)


def ref_forward(c, x, p):
    h = _mm(x, p["fc_w"]) + p["fc_b"]
    skips = jnp.zeros(h.shape[:2] + (SKIP_CH,), jnp.float32)
    for layer in range(LAYERS):
        d = DILATIONS[layer]
        residual = h
        acc = jnp.broadcast_to(p["conv_b"][layer], h.shape[:2] + (GATE_CH,))
        for k in range(KSIZE):
            s = (KSIZE - 1 - k) * d
            if s == 0:
                xs = h
            elif s >= T:
                xs = jnp.zeros_like(h)
            else:
                xs = jnp.concatenate(
                    [jnp.zeros((h.shape[0], s, RES_CH), jnp.float32),
                     h[:, : T - s, :]], axis=1)
            acc = acc + _mm(xs, p["conv_w"][layer, k])
        cond = _mm(c, p["cond_w"][layer])
        a = acc[..., :GATE_HALF] + cond[..., :GATE_HALF]
        b = acc[..., GATE_HALF:] + cond[..., GATE_HALF:]
        g = jnp.tanh(a) * jax.nn.sigmoid(b)
        skips = skips + _mm(g, p["skip_w"][layer]) + p["skip_b"][layer]
        h = _mm(g, p["out_w"][layer]) + p["out_b"][layer] + residual
    y = jax.nn.relu(skips)
    y = _mm(y, p["l1_w"]) + p["l1_b"]
    y = jax.nn.relu(y)
    y = _mm(y, p["l2_w"]) + p["l2_b"]
    return y


# ------------------------------ param init -----------------------------------
def init_params(key):
    ks = jax.random.split(key, 13)
    n = lambda k, shape: (0.1 * jax.random.normal(k, shape)).astype(jnp.float32)
    return {
        "fc_w":   n(ks[0], (OUT_DIM, RES_CH)),
        "fc_b":   n(ks[1], (1, RES_CH)),
        "conv_w": n(ks[2], (LAYERS, KSIZE, RES_CH, GATE_CH)),   # (layer, tap, Cin, Cout)
        "conv_b": n(ks[3], (LAYERS, 1, GATE_CH)),
        "cond_w": n(ks[4], (LAYERS, IN_DIM, GATE_CH)),          # conv1x1c, bias=False
        "out_w":  n(ks[5], (LAYERS, GATE_HALF, RES_CH)),
        "out_b":  n(ks[6], (LAYERS, 1, RES_CH)),
        "skip_w": n(ks[7], (LAYERS, GATE_HALF, SKIP_CH)),
        "skip_b": n(ks[8], (LAYERS, 1, SKIP_CH)),
        "l1_w":   n(ks[9], (SKIP_CH, SKIP_CH)),
        "l1_b":   n(ks[10], (1, SKIP_CH)),
        "l2_w":   n(ks[11], (SKIP_CH, OUT_DIM)),
        "l2_b":   n(ks[12], (1, OUT_DIM)),
    }


# TODO(synk): autoregressive `inference()` (OneHotCategorical sampling loop) is a
# host-side sequential sampler and is not implemented as a kernel.

if __name__ == "__main__":
    key = jax.random.PRNGKey(0)
    kp, kc, kx = jax.random.split(key, 3)
    params = init_params(kp)
    c = jax.random.normal(kc, (B, T, IN_DIM), dtype=jnp.float32)
    x = jax.random.normal(kx, (B, T, OUT_DIM), dtype=jnp.float32)

    out = jax.block_until_ready(wavenet_forward(c, x, params))
    ref = jax.block_until_ready(ref_forward(c, x, params))

    # both paths use bf16 matmul operands with f32 accumulation; only the
    # fusion/accumulation order differs, so a moderate tolerance suffices.
    np.testing.assert_allclose(np.asarray(out), np.asarray(ref),
                               rtol=1e-2, atol=1e-2)

    print("KERNEL_OK")
</pallas_src>

<mosaic_0001>
module attributes {stable_mosaic.version = 11 : i64} {
  func.func @wavenet_kernel(%arg0: i32, %arg1: memref<32x32xf32, #tpu.memory_space<vmem>>, %arg2: memref<32x16xf32, #tpu.memory_space<vmem>>, %arg3: memref<16x16xbf16, #tpu.memory_space<vmem>>, %arg4: memref<1x16xf32, #tpu.memory_space<vmem>>, %arg5: memref<4x80x32xbf16, #tpu.memory_space<vmem>>, %arg6: memref<4x1x32xf32, #tpu.memory_space<vmem>>, %arg7: memref<4x16x32xbf16, #tpu.memory_space<vmem>>, %arg8: memref<4x1x32xf32, #tpu.memory_space<vmem>>, %arg9: memref<16x16xbf16, #tpu.memory_space<vmem>>, %arg10: memref<1x16xf32, #tpu.memory_space<vmem>>, %arg11: memref<16x16xbf16, #tpu.memory_space<vmem>>, %arg12: memref<1x16xf32, #tpu.memory_space<vmem>>, %arg13: memref<32x16xf32, #tpu.memory_space<vmem>>) attributes {dimension_semantics = [#tpu.dimension_semantics<parallel>], iteration_bounds = array<i64: 1>, scalar_prefetch = 0 : i64, scratch_operands = 0 : i64, tpu.core_type = #tpu.core_type<tc>, window_params = [{transform_indices = @transform_0, window_bounds = array<i64: 32, 32>}, {transform_indices = @transform_1, window_bounds = array<i64: 32, 16>}, {pipeline_mode = #tpu.pipeline_mode<synchronous>, transform_indices = @transform_2, window_bounds = array<i64: 16, 16>}, {pipeline_mode = #tpu.pipeline_mode<synchronous>, transform_indices = @transform_3, window_bounds = array<i64: 1, 16>}, {pipeline_mode = #tpu.pipeline_mode<synchronous>, transform_indices = @transform_4, window_bounds = array<i64: 4, 80, 32>}, {pipeline_mode = #tpu.pipeline_mode<synchronous>, transform_indices = @transform_5, window_bounds = array<i64: 4, 1, 32>}, {pipeline_mode = #tpu.pipeline_mode<synchronous>, transform_indices = @transform_6, window_bounds = array<i64: 4, 16, 32>}, {pipeline_mode = #tpu.pipeline_mode<synchronous>, transform_indices = @transform_7, window_bounds = array<i64: 4, 1, 32>}, {pipeline_mode = #tpu.pipeline_mode<synchronous>, transform_indices = @transform_8, window_bounds = array<i64: 16, 16>}, {pipeline_mode = #tpu.pipeline_mode<synchronous>, transform_indices = @transform_9, window_bounds = array<i64: 1, 16>}, {pipeline_mode = #tpu.pipeline_mode<synchronous>, transform_indices = @transform_10, window_bounds = array<i64: 16, 16>}, {pipeline_mode = #tpu.pipeline_mode<synchronous>, transform_indices = @transform_11, window_bounds = array<i64: 1, 16>}, {transform_indices = @transform_12, window_bounds = array<i64: 32, 16>}]} {
    %c0 = arith.constant 0 : index
    %c0_0 = arith.constant 0 : index
    %0 = vector.load %arg2[%c0, %c0_0] : memref<32x16xf32, #tpu.memory_space<vmem>>, vector<32x16xf32>
    %c0_1 = arith.constant 0 : index
    %c0_2 = arith.constant 0 : index
    %1 = vector.load %arg1[%c0_1, %c0_2] : memref<32x32xf32, #tpu.memory_space<vmem>>, vector<32x32xf32>
    %2 = tpu.iota {dimensions = array<i32: 0>} : vector<32x1xi32>
    %c16_i32 = arith.constant 16 : i32
    %c0_i32 = arith.constant 0 : i32
    %3 = arith.cmpi eq, %c16_i32, %c0_i32 : i32
    %c1_i32 = arith.constant 1 : i32
    %4 = arith.select %3, %c1_i32, %c16_i32 : i32
    %5 = vector.broadcast %4 : i32 to vector<32x1xi32>
    %6 = arith.remsi %2, %5 : vector<32x1xi32>
    %c0_i32_3 = arith.constant 0 : i32
    %7 = vector.broadcast %c0_i32_3 : i32 to vector<32x1xi32>
    %8 = arith.cmpi ne, %6, %7 : vector<32x1xi32>
    %c0_i32_4 = arith.constant 0 : i32
    %9 = vector.broadcast %c0_i32_4 : i32 to vector<32x1xi32>
    %10 = arith.cmpi slt, %6, %9 : vector<32x1xi32>
    %c0_i32_5 = arith.constant 0 : i32
    %11 = arith.cmpi slt, %4, %c0_i32_5 : i32
    %12 = vector.broadcast %11 : i1 to vector<32x1xi1>
    %13 = vector.broadcast %12 : vector<32x1xi1> to vector<32x1xi1>
    %14 = arith.xori %10, %13 : vector<32x1xi1>
    %15 = arith.andi %14, %8 : vector<32x1xi1>
    %16 = vector.broadcast %4 : i32 to vector<32x1xi32>
    %17 = arith.addi %6, %16 : vector<32x1xi32>
    %18 = arith.select %15, %17, %6 : vector<32x1xi1>, vector<32x1xi32>
    %c1_i32_6 = arith.constant 1 : i32
    %19 = vector.broadcast %c1_i32_6 : i32 to vector<32x1xi32>
    %20 = arith.cmpi sge, %18, %19 : vector<32x1xi32>
    %c2_i32 = arith.constant 2 : i32
    %21 = vector.broadcast %c2_i32 : i32 to vector<32x1xi32>
    %22 = arith.cmpi sge, %18, %21 : vector<32x1xi32>
    %c4_i32 = arith.constant 4 : i32
    %23 = vector.broadcast %c4_i32 : i32 to vector<32x1xi32>
    %24 = arith.cmpi sge, %18, %23 : vector<32x1xi32>
    %c8_i32 = arith.constant 8 : i32
    %25 = vector.broadcast %c8_i32 : i32 to vector<32x1xi32>
    %26 = arith.cmpi sge, %18, %25 : vector<32x1xi32>
    %c0_7 = arith.constant 0 : index
    %c0_8 = arith.constant 0 : index
    %27 = vector.load %arg3[%c0_7, %c0_8] : memref<16x16xbf16, #tpu.memory_space<vmem>>, vector<16x16xbf16>
    %28 = arith.truncf %0 : vector<32x16xf32> to vector<32x16xbf16>
    %cst = arith.constant dense<0.000000e+00> : vector<32x16xf32>
    %29 = tpu.matmul %28, %27, %cst {dimension_numbers = #tpu.dot_dimension_numbers<[1], [0], [0], [1], [0, 0, 1, 1], [], []>} : vector<32x16xbf16>, vector<16x16xbf16>, vector<32x16xf32> -> vector<32x16xf32>
    %c0_9 = arith.constant 0 : index
    %c0_10 = arith.constant 0 : index
    %30 = vector.load %arg4[%c0_9, %c0_10] : memref<1x16xf32, #tpu.memory_space<vmem>>, vector<1x16xf32>
    %31 = vector.broadcast %30 : vector<1x16xf32> to vector<32x16xf32>
    %32 = arith.addf %29, %31 : vector<32x16xf32>
    %cst_11 = arith.constant 0.000000e+00 : f32
    %33 = vector.broadcast %cst_11 : f32 to vector<32x16xf32>
    %cst_12 = arith.constant 0.000000e+00 : f32
    %34 = vector.broadcast %cst_12 : f32 to vector<2x16xf32>
    %35 = vector.extract_strided_slice %32 {offsets = [0, 0], sizes = [30, 16], strides = [1, 1]} : vector<32x16xf32> to vector<30x16xf32>
    %36 = tpu.concatenate %34, %35 in 0 : vector<2x16xf32>, vector<30x16xf32> -> vector<32x16xf32>
    %cst_13 = arith.constant 0.000000e+00 : f32
    %37 = vector.shape_cast %22 : vector<32x1xi1> to vector<32x1xi1>
    %38 = vector.broadcast %37 : vector<32x1xi1> to vector<32x16xi1>
    %39 = vector.broadcast %cst_13 : f32 to vector<32x16xf32>
    %40 = arith.select %38, %36, %39 : vector<32x16xi1>, vector<32x16xf32>
    %cst_14 = arith.constant 0.000000e+00 : f32
    %41 = vector.broadcast %cst_14 : f32 to vector<1x16xf32>
    %42 = vector.extract_strided_slice %32 {offsets = [0, 0], sizes = [31, 16], strides = [1, 1]} : vector<32x16xf32> to vector<31x16xf32>
    %43 = tpu.concatenate %41, %42 in 0 : vector<1x16xf32>, vector<31x16xf32> -> vector<32x16xf32>
    %cst_15 = arith.constant 0.000000e+00 : f32
    %44 = vector.shape_cast %20 : vector<32x1xi1> to vector<32x1xi1>
    %45 = vector.broadcast %44 : vector<32x1xi1> to vector<32x16xi1>
    %46 = vector.broadcast %cst_15 : f32 to vector<32x16xf32>
    %47 = arith.select %45, %43, %46 : vector<32x16xi1>, vector<32x16xf32>
    %48 = tpu.concatenate %40, %47, %32, %1 in 1 : vector<32x16xf32>, vector<32x16xf32>, vector<32x16xf32>, vector<32x32xf32> -> vector<32x80xf32>
    %c0_16 = arith.constant 0 : index
    %c0_17 = arith.constant 0 : index
    %c0_18 = arith.constant 0 : index
    %49 = vector.load %arg5[%c0_16, %c0_17, %c0_18] : memref<4x80x32xbf16, #tpu.memory_space<vmem>>, vector<1x80x32xbf16>
    %50 = vector.shape_cast %49 : vector<1x80x32xbf16> to vector<80x32xbf16>
    %51 = arith.truncf %48 : vector<32x80xf32> to vector<32x80xbf16>
    %cst_19 = arith.constant dense<0.000000e+00> : vector<32x32xf32>
    %52 = tpu.matmul %51, %50, %cst_19 {dimension_numbers = #tpu.dot_dimension_numbers<[1], [0], [0], [1], [0, 0, 1, 1], [], []>} : vector<32x80xbf16>, vector<80x32xbf16>, vector<32x32xf32> -> vector<32x32xf32>
    %c0_20 = arith.constant 0 : index
    %c0_21 = arith.constant 0 : index
    %c0_22 = arith.constant 0 : index
    %53 = vector.load %arg6[%c0_20, %c0_21, %c0_22] : memref<4x1x32xf32, #tpu.memory_space<vmem>>, vector<1x1x32xf32>
    %54 = vector.shape_cast %53 : vector<1x1x32xf32> to vector<1x32xf32>
    %55 = vector.broadcast %54 : vector<1x32xf32> to vector<32x32xf32>
    %56 = arith.addf %52, %55 : vector<32x32xf32>
    %57 = vector.extract_strided_slice %56 {offsets = [0, 0], sizes = [32, 16], strides = [1, 1]} : vector<32x32xf32> to vector<32x16xf32>
    %58 = vector.extract_strided_slice %56 {offsets = [0, 16], sizes = [32, 16], strides = [1, 1]} : vector<32x32xf32> to vector<32x16xf32>
    %59 = math.tanh %57 : vector<32x16xf32>
    %60 = arith.negf %58 : vector<32x16xf32>
    %61 = math.exp %60 : vector<32x16xf32>
    %cst_23 = arith.constant 1.000000e+00 : f32
    %62 = vector.broadcast %cst_23 : f32 to vector<32x16xf32>
    %63 = arith.addf %62, %61 : vector<32x16xf32>
    %64 = arith.divf %62, %63 : vector<32x16xf32>
    %65 = arith.mulf %59, %64 : vector<32x16xf32>
    %c0_24 = arith.constant 0 : index
    %c0_25 = arith.constant 0 : index
    %c0_26 = arith.constant 0 : index
    %66 = vector.load %arg7[%c0_24, %c0_25, %c0_26] : memref<4x16x32xbf16, #tpu.memory_space<vmem>>, vector<1x16x32xbf16>
    %67 = vector.shape_cast %66 : vector<1x16x32xbf16> to vector<16x32xbf16>
    %68 = arith.truncf %65 : vector<32x16xf32> to vector<32x16xbf16>
    %cst_27 = arith.constant dense<0.000000e+00> : vector<32x32xf32>
    %69 = tpu.matmul %68, %67, %cst_27 {dimension_numbers = #tpu.dot_dimension_numbers<[1], [0], [0], [1], [0, 0, 1, 1], [], []>} : vector<32x16xbf16>, vector<16x32xbf16>, vector<32x32xf32> -> vector<32x32xf32>
    %c0_28 = arith.constant 0 : index
    %c0_29 = arith.constant 0 : index
    %c0_30 = arith.constant 0 : index
    %70 = vector.load %arg8[%c0_28, %c0_29, %c0_30] : memref<4x1x32xf32, #tpu.memory_space<vmem>>, vector<1x1x32xf32>
    %71 = vector.shape_cast %70 : vector<1x1x32xf32> to vector<1x32xf32>
    %72 = vector.broadcast %71 : vector<1x32xf32> to vector<32x32xf32>
    %73 = arith.addf %69, %72 : vector<32x32xf32>
    %74 = vector.extract_strided_slice %73 {offsets = [0, 0], sizes = [32, 16], strides = [1, 1]} : vector<32x32xf32> to vector<32x16xf32>
    %75 = arith.addf %33, %74 : vector<32x16xf32>
    %76 = vector.extract_strided_slice %73 {offsets = [0, 16], sizes = [32, 16], strides = [1, 1]} : vector<32x32xf32> to vector<32x16xf32>
    %77 = arith.addf %76, %32 : vector<32x16xf32>
    %cst_31 = arith.constant 0.000000e+00 : f32
    %78 = vector.broadcast %cst_31 : f32 to vector<4x16xf32>
    %79 = vector.extract_strided_slice %77 {offsets = [0, 0], sizes = [28, 16], strides = [1, 1]} : vector<32x16xf32> to vector<28x16xf32>
    %80 = tpu.concatenate %78, %79 in 0 : vector<4x16xf32>, vector<28x16xf32> -> vector<32x16xf32>
    %cst_32 = arith.constant 0.000000e+00 : f32
    %81 = vector.shape_cast %24 : vector<32x1xi1> to vector<32x1xi1>
    %82 = vector.broadcast %81 : vector<32x1xi1> to vector<32x16xi1>
    %83 = vector.broadcast %cst_32 : f32 to vector<32x16xf32>
    %84 = arith.select %82, %80, %83 : vector<32x16xi1>, vector<32x16xf32>
    %cst_33 = arith.constant 0.000000e+00 : f32
    %85 = vector.broadcast %cst_33 : f32 to vector<2x16xf32>
    %86 = vector.extract_strided_slice %77 {offsets = [0, 0], sizes = [30, 16], strides = [1, 1]} : vector<32x16xf32> to vector<30x16xf32>
    %87 = tpu.concatenate %85, %86 in 0 : vector<2x16xf32>, vector<30x16xf32> -> vector<32x16xf32>
    %cst_34 = arith.constant 0.000000e+00 : f32
    %88 = vector.shape_cast %22 : vector<32x1xi1> to vector<32x1xi1>
    %89 = vector.broadcast %88 : vector<32x1xi1> to vector<32x16xi1>
    %90 = vector.broadcast %cst_34 : f32 to vector<32x16xf32>
    %91 = arith.select %89, %87, %90 : vector<32x16xi1>, vector<32x16xf32>
    %92 = tpu.concatenate %84, %91, %77, %1 in 1 : vector<32x16xf32>, vector<32x16xf32>, vector<32x16xf32>, vector<32x32xf32> -> vector<32x80xf32>
    %c1 = arith.constant 1 : index
    %c0_35 = arith.constant 0 : index
    %c0_36 = arith.constant 0 : index
    %93 = vector.load %arg5[%c1, %c0_35, %c0_36] : memref<4x80x32xbf16, #tpu.memory_space<vmem>>, vector<1x80x32xbf16>
    %94 = vector.shape_cast %93 : vector<1x80x32xbf16> to vector<80x32xbf16>
    %95 = arith.truncf %92 : vector<32x80xf32> to vector<32x80xbf16>
    %cst_37 = arith.constant dense<0.000000e+00> : vector<32x32xf32>
    %96 = tpu.matmul %95, %94, %cst_37 {dimension_numbers = #tpu.dot_dimension_numbers<[1], [0], [0], [1], [0, 0, 1, 1], [], []>} : vector<32x80xbf16>, vector<80x32xbf16>, vector<32x32xf32> -> vector<32x32xf32>
    %c1_38 = arith.constant 1 : index
    %c0_39 = arith.constant 0 : index
    %c0_40 = arith.constant 0 : index
    %97 = vector.load %arg6[%c1_38, %c0_39, %c0_40] : memref<4x1x32xf32, #tpu.memory_space<vmem>>, vector<1x1x32xf32>
    %98 = vector.shape_cast %97 : vector<1x1x32xf32> to vector<1x32xf32>
    %99 = vector.broadcast %98 : vector<1x32xf32> to vector<32x32xf32>
    %100 = arith.addf %96, %99 : vector<32x32xf32>
    %101 = vector.extract_strided_slice %100 {offsets = [0, 0], sizes = [32, 16], strides = [1, 1]} : vector<32x32xf32> to vector<32x16xf32>
    %102 = vector.extract_strided_slice %100 {offsets = [0, 16], sizes = [32, 16], strides = [1, 1]} : vector<32x32xf32> to vector<32x16xf32>
    %103 = math.tanh %101 : vector<32x16xf32>
    %104 = arith.negf %102 : vector<32x16xf32>
    %105 = math.exp %104 : vector<32x16xf32>
    %cst_41 = arith.constant 1.000000e+00 : f32
    %106 = vector.broadcast %cst_41 : f32 to vector<32x16xf32>
    %107 = arith.addf %106, %105 : vector<32x16xf32>
    %108 = arith.divf %106, %107 : vector<32x16xf32>
    %109 = arith.mulf %103, %108 : vector<32x16xf32>
    %c1_42 = arith.constant 1 : index
    %c0_43 = arith.constant 0 : index
    %c0_44 = arith.constant 0 : index
    %110 = vector.load %arg7[%c1_42, %c0_43, %c0_44] : memref<4x16x32xbf16, #tpu.memory_space<vmem>>, vector<1x16x32xbf16>
    %111 = vector.shape_cast %110 : vector<1x16x32xbf16> to vector<16x32xbf16>
    %112 = arith.truncf %109 : vector<32x16xf32> to vector<32x16xbf16>
    %cst_45 = arith.constant dense<0.000000e+00> : vector<32x32xf32>
    %113 = tpu.matmul %112, %111, %cst_45 {dimension_numbers = #tpu.dot_dimension_numbers<[1], [0], [0], [1], [0, 0, 1, 1], [], []>} : vector<32x16xbf16>, vector<16x32xbf16>, vector<32x32xf32> -> vector<32x32xf32>
    %c1_46 = arith.constant 1 : index
    %c0_47 = arith.constant 0 : index
    %c0_48 = arith.constant 0 : index
    %114 = vector.load %arg8[%c1_46, %c0_47, %c0_48] : memref<4x1x32xf32, #tpu.memory_space<vmem>>, vector<1x1x32xf32>
    %115 = vector.shape_cast %114 : vector<1x1x32xf32> to vector<1x32xf32>
    %116 = vector.broadcast %115 : vector<1x32xf32> to vector<32x32xf32>
    %117 = arith.addf %113, %116 : vector<32x32xf32>
    %118 = vector.extract_strided_slice %117 {offsets = [0, 0], sizes = [32, 16], strides = [1, 1]} : vector<32x32xf32> to vector<32x16xf32>
    %119 = arith.addf %75, %118 : vector<32x16xf32>
    %120 = vector.extract_strided_slice %117 {offsets = [0, 16], sizes = [32, 16], strides = [1, 1]} : vector<32x32xf32> to vector<32x16xf32>
    %121 = arith.addf %120, %77 : vector<32x16xf32>
    %cst_49 = arith.constant 0.000000e+00 : f32
    %122 = vector.broadcast %cst_49 : f32 to vector<8x16xf32>
    %123 = vector.extract_strided_slice %121 {offsets = [0, 0], sizes = [24, 16], strides = [1, 1]} : vector<32x16xf32> to vector<24x16xf32>
    %124 = tpu.concatenate %122, %123 in 0 : vector<8x16xf32>, vector<24x16xf32> -> vector<32x16xf32>
    %cst_50 = arith.constant 0.000000e+00 : f32
    %125 = vector.shape_cast %26 : vector<32x1xi1> to vector<32x1xi1>
    %126 = vector.broadcast %125 : vector<32x1xi1> to vector<32x16xi1>
    %127 = vector.broadcast %cst_50 : f32 to vector<32x16xf32>
    %128 = arith.select %126, %124, %127 : vector<32x16xi1>, vector<32x16xf32>
    %cst_51 = arith.constant 0.000000e+00 : f32
    %129 = vector.broadcast %cst_51 : f32 to vector<4x16xf32>
    %130 = vector.extract_strided_slice %121 {offsets = [0, 0], sizes = [28, 16], strides = [1, 1]} : vector<32x16xf32> to vector<28x16xf32>
    %131 = tpu.concatenate %129, %130 in 0 : vector<4x16xf32>, vector<28x16xf32> -> vector<32x16xf32>
    %cst_52 = arith.constant 0.000000e+00 : f32
    %132 = vector.shape_cast %24 : vector<32x1xi1> to vector<32x1xi1>
    %133 = vector.broadcast %132 : vector<32x1xi1> to vector<32x16xi1>
    %134 = vector.broadcast %cst_52 : f32 to vector<32x16xf32>
    %135 = arith.select %133, %131, %134 : vector<32x16xi1>, vector<32x16xf32>
    %136 = tpu.concatenate %128, %135, %121, %1 in 1 : vector<32x16xf32>, vector<32x16xf32>, vector<32x16xf32>, vector<32x32xf32> -> vector<32x80xf32>
    %c2 = arith.constant 2 : index
    %c0_53 = arith.constant 0 : index
    %c0_54 = arith.constant 0 : index
    %137 = vector.load %arg5[%c2, %c0_53, %c0_54] : memref<4x80x32xbf16, #tpu.memory_space<vmem>>, vector<1x80x32xbf16>
    %138 = vector.shape_cast %137 : vector<1x80x32xbf16> to vector<80x32xbf16>
    %139 = arith.truncf %136 : vector<32x80xf32> to vector<32x80xbf16>
    %cst_55 = arith.constant dense<0.000000e+00> : vector<32x32xf32>
    %140 = tpu.matmul %139, %138, %cst_55 {dimension_numbers = #tpu.dot_dimension_numbers<[1], [0], [0], [1], [0, 0, 1, 1], [], []>} : vector<32x80xbf16>, vector<80x32xbf16>, vector<32x32xf32> -> vector<32x32xf32>
    %c2_56 = arith.constant 2 : index
    %c0_57 = arith.constant 0 : index
    %c0_58 = arith.constant 0 : index
    %141 = vector.load %arg6[%c2_56, %c0_57, %c0_58] : memref<4x1x32xf32, #tpu.memory_space<vmem>>, vector<1x1x32xf32>
    %142 = vector.shape_cast %141 : vector<1x1x32xf32> to vector<1x32xf32>
    %143 = vector.broadcast %142 : vector<1x32xf32> to vector<32x32xf32>
    %144 = arith.addf %140, %143 : vector<32x32xf32>
    %145 = vector.extract_strided_slice %144 {offsets = [0, 0], sizes = [32, 16], strides = [1, 1]} : vector<32x32xf32> to vector<32x16xf32>
    %146 = vector.extract_strided_slice %144 {offsets = [0, 16], sizes = [32, 16], strides = [1, 1]} : vector<32x32xf32> to vector<32x16xf32>
    %147 = math.tanh %145 : vector<32x16xf32>
    %148 = arith.negf %146 : vector<32x16xf32>
    %149 = math.exp %148 : vector<32x16xf32>
    %cst_59 = arith.constant 1.000000e+00 : f32
    %150 = vector.broadcast %cst_59 : f32 to vector<32x16xf32>
    %151 = arith.addf %150, %149 : vector<32x16xf32>
    %152 = arith.divf %150, %151 : vector<32x16xf32>
    %153 = arith.mulf %147, %152 : vector<32x16xf32>
    %c2_60 = arith.constant 2 : index
    %c0_61 = arith.constant 0 : index
    %c0_62 = arith.constant 0 : index
    %154 = vector.load %arg7[%c2_60, %c0_61, %c0_62] : memref<4x16x32xbf16, #tpu.memory_space<vmem>>, vector<1x16x32xbf16>
    %155 = vector.shape_cast %154 : vector<1x16x32xbf16> to vector<16x32xbf16>
    %156 = arith.truncf %153 : vector<32x16xf32> to vector<32x16xbf16>
    %cst_63 = arith.constant dense<0.000000e+00> : vector<32x32xf32>
    %157 = tpu.matmul %156, %155, %cst_63 {dimension_numbers = #tpu.dot_dimension_numbers<[1], [0], [0], [1], [0, 0, 1, 1], [], []>} : vector<32x16xbf16>, vector<16x32xbf16>, vector<32x32xf32> -> vector<32x32xf32>
    %c2_64 = arith.constant 2 : index
    %c0_65 = arith.constant 0 : index
    %c0_66 = arith.constant 0 : index
    %158 = vector.load %arg8[%c2_64, %c0_65, %c0_66] : memref<4x1x32xf32, #tpu.memory_space<vmem>>, vector<1x1x32xf32>
    %159 = vector.shape_cast %158 : vector<1x1x32xf32> to vector<1x32xf32>
    %160 = vector.broadcast %159 : vector<1x32xf32> to vector<32x32xf32>
    %161 = arith.addf %157, %160 : vector<32x32xf32>
    %162 = vector.extract_strided_slice %161 {offsets = [0, 0], sizes = [32, 16], strides = [1, 1]} : vector<32x32xf32> to vector<32x16xf32>
    %163 = arith.addf %119, %162 : vector<32x16xf32>
    %164 = vector.extract_strided_slice %161 {offsets = [0, 16], sizes = [32, 16], strides = [1, 1]} : vector<32x32xf32> to vector<32x16xf32>
    %165 = arith.addf %164, %121 : vector<32x16xf32>
    %cst_67 = arith.constant 0.000000e+00 : f32
    %166 = vector.broadcast %cst_67 : f32 to vector<32x16xf32>
    %cst_68 = arith.constant 0.000000e+00 : f32
    %167 = vector.broadcast %cst_68 : f32 to vector<8x16xf32>
    %168 = vector.extract_strided_slice %165 {offsets = [0, 0], sizes = [24, 16], strides = [1, 1]} : vector<32x16xf32> to vector<24x16xf32>
    %169 = tpu.concatenate %167, %168 in 0 : vector<8x16xf32>, vector<24x16xf32> -> vector<32x16xf32>
    %cst_69 = arith.constant 0.000000e+00 : f32
    %170 = vector.shape_cast %26 : vector<32x1xi1> to vector<32x1xi1>
    %171 = vector.broadcast %170 : vector<32x1xi1> to vector<32x16xi1>
    %172 = vector.broadcast %cst_69 : f32 to vector<32x16xf32>
    %173 = arith.select %171, %169, %172 : vector<32x16xi1>, vector<32x16xf32>
    %174 = tpu.concatenate %166, %173, %165, %1 in 1 : vector<32x16xf32>, vector<32x16xf32>, vector<32x16xf32>, vector<32x32xf32> -> vector<32x80xf32>
    %c3 = arith.constant 3 : index
    %c0_70 = arith.constant 0 : index
    %c0_71 = arith.constant 0 : index
    %175 = vector.load %arg5[%c3, %c0_70, %c0_71] : memref<4x80x32xbf16, #tpu.memory_space<vmem>>, vector<1x80x32xbf16>
    %176 = vector.shape_cast %175 : vector<1x80x32xbf16> to vector<80x32xbf16>
    %177 = arith.truncf %174 : vector<32x80xf32> to vector<32x80xbf16>
    %cst_72 = arith.constant dense<0.000000e+00> : vector<32x32xf32>
    %178 = tpu.matmul %177, %176, %cst_72 {dimension_numbers = #tpu.dot_dimension_numbers<[1], [0], [0], [1], [0, 0, 1, 1], [], []>} : vector<32x80xbf16>, vector<80x32xbf16>, vector<32x32xf32> -> vector<32x32xf32>
    %c3_73 = arith.constant 3 : index
    %c0_74 = arith.constant 0 : index
    %c0_75 = arith.constant 0 : index
    %179 = vector.load %arg6[%c3_73, %c0_74, %c0_75] : memref<4x1x32xf32, #tpu.memory_space<vmem>>, vector<1x1x32xf32>
    %180 = vector.shape_cast %179 : vector<1x1x32xf32> to vector<1x32xf32>
    %181 = vector.broadcast %180 : vector<1x32xf32> to vector<32x32xf32>
    %182 = arith.addf %178, %181 : vector<32x32xf32>
    %183 = vector.extract_strided_slice %182 {offsets = [0, 0], sizes = [32, 16], strides = [1, 1]} : vector<32x32xf32> to vector<32x16xf32>
    %184 = vector.extract_strided_slice %182 {offsets = [0, 16], sizes = [32, 16], strides = [1, 1]} : vector<32x32xf32> to vector<32x16xf32>
    %185 = math.tanh %183 : vector<32x16xf32>
    %186 = arith.negf %184 : vector<32x16xf32>
    %187 = math.exp %186 : vector<32x16xf32>
    %cst_76 = arith.constant 1.000000e+00 : f32
    %188 = vector.broadcast %cst_76 : f32 to vector<32x16xf32>
    %189 = arith.addf %188, %187 : vector<32x16xf32>
    %190 = arith.divf %188, %189 : vector<32x16xf32>
    %191 = arith.mulf %185, %190 : vector<32x16xf32>
    %c3_77 = arith.constant 3 : index
    %c0_78 = arith.constant 0 : index
    %c0_79 = arith.constant 0 : index
    %192 = vector.load %arg7[%c3_77, %c0_78, %c0_79] : memref<4x16x32xbf16, #tpu.memory_space<vmem>>, vector<1x16x32xbf16>
    %193 = vector.shape_cast %192 : vector<1x16x32xbf16> to vector<16x32xbf16>
    %194 = arith.truncf %191 : vector<32x16xf32> to vector<32x16xbf16>
    %cst_80 = arith.constant dense<0.000000e+00> : vector<32x32xf32>
    %195 = tpu.matmul %194, %193, %cst_80 {dimension_numbers = #tpu.dot_dimension_numbers<[1], [0], [0], [1], [0, 0, 1, 1], [], []>} : vector<32x16xbf16>, vector<16x32xbf16>, vector<32x32xf32> -> vector<32x32xf32>
    %c3_81 = arith.constant 3 : index
    %c0_82 = arith.constant 0 : index
    %c0_83 = arith.constant 0 : index
    %196 = vector.load %arg8[%c3_81, %c0_82, %c0_83] : memref<4x1x32xf32, #tpu.memory_space<vmem>>, vector<1x1x32xf32>
    %197 = vector.shape_cast %196 : vector<1x1x32xf32> to vector<1x32xf32>
    %198 = vector.broadcast %197 : vector<1x32xf32> to vector<32x32xf32>
    %199 = arith.addf %195, %198 : vector<32x32xf32>
    %200 = vector.extract_strided_slice %199 {offsets = [0, 0], sizes = [32, 16], strides = [1, 1]} : vector<32x32xf32> to vector<32x16xf32>
    %201 = arith.addf %163, %200 : vector<32x16xf32>
    %cst_84 = arith.constant 0.000000e+00 : f32
    %202 = vector.broadcast %cst_84 : f32 to vector<32x16xf32>
    %203 = arith.maximumf %201, %202 : vector<32x16xf32>
    %c0_85 = arith.constant 0 : index
    %c0_86 = arith.constant 0 : index
    %204 = vector.load %arg9[%c0_85, %c0_86] : memref<16x16xbf16, #tpu.memory_space<vmem>>, vector<16x16xbf16>
    %205 = arith.truncf %203 : vector<32x16xf32> to vector<32x16xbf16>
    %cst_87 = arith.constant dense<0.000000e+00> : vector<32x16xf32>
    %206 = tpu.matmul %205, %204, %cst_87 {dimension_numbers = #tpu.dot_dimension_numbers<[1], [0], [0], [1], [0, 0, 1, 1], [], []>} : vector<32x16xbf16>, vector<16x16xbf16>, vector<32x16xf32> -> vector<32x16xf32>
    %c0_88 = arith.constant 0 : index
    %c0_89 = arith.constant 0 : index
    %207 = vector.load %arg10[%c0_88, %c0_89] : memref<1x16xf32, #tpu.memory_space<vmem>>, vector<1x16xf32>
    %208 = vector.broadcast %207 : vector<1x16xf32> to vector<32x16xf32>
    %209 = arith.addf %206, %208 : vector<32x16xf32>
    %cst_90 = arith.constant 0.000000e+00 : f32
    %210 = vector.broadcast %cst_90 : f32 to vector<32x16xf32>
    %211 = arith.maximumf %209, %210 : vector<32x16xf32>
    %c0_91 = arith.constant 0 : index
    %c0_92 = arith.constant 0 : index
    %212 = vector.load %arg11[%c0_91, %c0_92] : memref<16x16xbf16, #tpu.memory_space<vmem>>, vector<16x16xbf16>
    %213 = arith.truncf %211 : vector<32x16xf32> to vector<32x16xbf16>
    %cst_93 = arith.constant dense<0.000000e+00> : vector<32x16xf32>
    %214 = tpu.matmul %213, %212, %cst_93 {dimension_numbers = #tpu.dot_dimension_numbers<[1], [0], [0], [1], [0, 0, 1, 1], [], []>} : vector<32x16xbf16>, vector<16x16xbf16>, vector<32x16xf32> -> vector<32x16xf32>
    %c0_94 = arith.constant 0 : index
    %c0_95 = arith.constant 0 : index
    %215 = vector.load %arg12[%c0_94, %c0_95] : memref<1x16xf32, #tpu.memory_space<vmem>>, vector<1x16xf32>
    %216 = vector.broadcast %215 : vector<1x16xf32> to vector<32x16xf32>
    %217 = arith.addf %214, %216 : vector<32x16xf32>
    %c0_96 = arith.constant 0 : index
    %c0_97 = arith.constant 0 : index
    %218 = vector.load %arg13[%c0_96, %c0_97] : memref<32x16xf32, #tpu.memory_space<vmem>>, vector<32x16xf32>
    tpu.vector_store %arg13[%c0_96, %c0_97], %217 {strides = array<i32>} : memref<32x16xf32, #tpu.memory_space<vmem>>, vector<32x16xf32>,
    return
  }
  func.func @transform_0(%arg0: i32) -> (i32, i32) {
    %c0_i32 = arith.constant 0 : i32
    %c0_i32_0 = arith.constant 0 : i32
    return %arg0, %c0_i32 : i32, i32
  }
  func.func @transform_1(%arg0: i32) -> (i32, i32) {
    %c0_i32 = arith.constant 0 : i32
    %c0_i32_0 = arith.constant 0 : i32
    return %arg0, %c0_i32 : i32, i32
  }
  func.func @transform_2(%arg0: i32) -> (i32, i32) {
    %c0_i32 = arith.constant 0 : i32
    %c0_i32_0 = arith.constant 0 : i32
    %c0_i32_1 = arith.constant 0 : i32
    return %c0_i32, %c0_i32_0 : i32, i32
  }
  func.func @transform_3(%arg0: i32) -> (i32, i32) {
    %c0_i32 = arith.constant 0 : i32
    %c0_i32_0 = arith.constant 0 : i32
    %c0_i32_1 = arith.constant 0 : i32
    return %c0_i32, %c0_i32_0 : i32, i32
  }
  func.func @transform_4(%arg0: i32) -> (i32, i32, i32) {
    %c0_i32 = arith.constant 0 : i32
    %c0_i32_0 = arith.constant 0 : i32
    %c0_i32_1 = arith.constant 0 : i32
    %c0_i32_2 = arith.constant 0 : i32
    return %c0_i32, %c0_i32_0, %c0_i32_1 : i32, i32, i32
  }
  func.func @transform_5(%arg0: i32) -> (i32, i32, i32) {
    %c0_i32 = arith.constant 0 : i32
    %c0_i32_0 = arith.constant 0 : i32
    %c0_i32_1 = arith.constant 0 : i32
    %c0_i32_2 = arith.constant 0 : i32
    return %c0_i32, %c0_i32_0, %c0_i32_1 : i32, i32, i32
  }
  func.func @transform_6(%arg0: i32) -> (i32, i32, i32) {
    %c0_i32 = arith.constant 0 : i32
    %c0_i32_0 = arith.constant 0 : i32
    %c0_i32_1 = arith.constant 0 : i32
    %c0_i32_2 = arith.constant 0 : i32
    return %c0_i32, %c0_i32_0, %c0_i32_1 : i32, i32, i32
  }
  func.func @transform_7(%arg0: i32) -> (i32, i32, i32) {
    %c0_i32 = arith.constant 0 : i32
    %c0_i32_0 = arith.constant 0 : i32
    %c0_i32_1 = arith.constant 0 : i32
    %c0_i32_2 = arith.constant 0 : i32
    return %c0_i32, %c0_i32_0, %c0_i32_1 : i32, i32, i32
  }
  func.func @transform_8(%arg0: i32) -> (i32, i32) {
    %c0_i32 = arith.constant 0 : i32
    %c0_i32_0 = arith.constant 0 : i32
    %c0_i32_1 = arith.constant 0 : i32
    return %c0_i32, %c0_i32_0 : i32, i32
  }
  func.func @transform_9(%arg0: i32) -> (i32, i32) {
    %c0_i32 = arith.constant 0 : i32
    %c0_i32_0 = arith.constant 0 : i32
    %c0_i32_1 = arith.constant 0 : i32
    return %c0_i32, %c0_i32_0 : i32, i32
  }
  func.func @transform_10(%arg0: i32) -> (i32, i32) {
    %c0_i32 = arith.constant 0 : i32
    %c0_i32_0 = arith.constant 0 : i32
    %c0_i32_1 = arith.constant 0 : i32
    return %c0_i32, %c0_i32_0 : i32, i32
  }
  func.func @transform_11(%arg0: i32) -> (i32, i32) {
    %c0_i32 = arith.constant 0 : i32
    %c0_i32_0 = arith.constant 0 : i32
    %c0_i32_1 = arith.constant 0 : i32
    return %c0_i32, %c0_i32_0 : i32, i32
  }
  func.func @transform_12(%arg0: i32) -> (i32, i32) {
    %c0_i32 = arith.constant 0 : i32
    %c0_i32_0 = arith.constant 0 : i32
    return %arg0, %c0_i32 : i32, i32
  }
}

</mosaic_0001>

<bundles_post_ra>
// kernel: tpu_custom_call.1
= control target key start
LH: loop header
LB: loop body
LE: loop exit
PB: predicated region body
PF: predicated region fallthrough
CT: control target
= control target key end

     0   :  { %vm135_vm0 = vcmask 130048   ;;  %v50_v8 = vlaneseq  ;;  %vm220_vm1 = vcmask 1040384   ;;  %s2178_s20 = smov 32   ;;  %s2179_s27 = smov 16   ;;  %vm195_vm4 = vcmask 1041408   ;;  %s2698_s2 = inlined_call_operand.vmem [shape: bf16[16,16], index: 2, kind: input, shape index: {}]   ;;  %s2699_s1 = inlined_call_operand.vmem [shape: f32[32,16], index: 1, kind: input, shape index: {}]   ;;  %s2700_s4 = inlined_call_operand.vmem [shape: bf16[4,80,32], index: 4, kind: input, shape index: {}]   ;;  %s2701_s3 = inlined_call_operand.vmem [shape: f32[1,16], index: 3, kind: input, shape index: {}]   ;;  %s2702_s0 = inlined_call_operand.vmem [shape: f32[32,32], index: 0, kind: input, shape index: {}]   ;;  %s2703_s5 = inlined_call_operand.vmem [shape: f32[4,1,32], index: 5, kind: input, shape index: {}]   ;;  %s2704_s6 = inlined_call_operand.vmem [shape: bf16[4,16,32], index: 6, kind: input, shape index: {}]   ;;  %s2705_s7 = inlined_call_operand.vmem [shape: f32[4,1,32], index: 7, kind: input, shape index: {}]   ;;  %s2706_s8 = inlined_call_operand.vmem [shape: bf16[16,16], index: 8, kind: input, shape index: {}]   ;;  %s2707_s10 = inlined_call_operand.vmem [shape: bf16[16,16], index: 10, kind: input, shape index: {}]   ;;  %s2708_s9 = inlined_call_operand.vmem [shape: f32[1,16], index: 9, kind: input, shape index: {}]   ;;  %s2709_s11 = inlined_call_operand.vmem [shape: f32[1,16], index: 11, kind: input, shape index: {}]   ;;  %s2710_s12 = inlined_call_operand.vmem [shape: f32[32,16], index: 12, kind: output, shape index: {}]  }
   0x1   :  { %v2055_v0 = vld [vmem:[%s2698_s2] sm:$0xff]   ;;  %v43_v2 = vld [vmem:[%s2699_s1 + $0x8] sm:$0xff]  ;;  %v44_v3 = vld [vmem:[%s2699_s1 + $0x10] sm:$0xff]  ;;  %s2180_s13 = smov 48   ;;  %vm293_vm7 = vcmask 261120   ;;  %vm298_vm8 = vcmask 392192  }
   0x2   :  { %v42_v1 = vld [vmem:[%s2699_s1] sm:$0xff]  ;;  %1822 = vmatprep.subr.bf16.mxu0 %v2055_v0  ;;  %v45_v5 = vld [vmem:[%s2699_s1 + $0x18] sm:$0xff]  ;;  %v51_v11 = vshrl.u32 %v50_v8, 7  ;;  %v2058_v16 = vld [vmem:[%s2700_s4 + $0x10] sm:$0xff]   ;;  %vm352_vm9 = vcmask 654336   ;;  %s2181_s16 = smov 112  }
   0x3   :  { %v120_v4 = vpack.c.bf16 %v43_v2, %v42_v1  ;;  %1823 = vmatpush3.bf16.msra.mxu0 %v2055_v0  ;;  %v121_v6 = vpack.c.bf16 %v45_v5, %v44_v3  ;;  %v2056_v7 = vld [vmem:[%s2700_s4 + $0x20] sm:$0xff]   ;;  %v2057_v9 = vld [vmem:[%s2700_s4 + $0x18] sm:$0xff]   ;;  %v2059_v26 = vld [vmem:[%s2700_s4 + $0x8] sm:$0xff]   ;;  %vm552_vm10 = vcmask 1043456  }
   0x4   :  { %1828 = vmatprep.subr.bf16.mxu1 %v2056_v7  ;;  %v1655_v12 = vld [vmem:[%s2701_s3] ss:$0 sm:$0xff]  ;;  %v53_v14 = vadd.s32 16, %v51_v11  ;;  %v2279_v18 = vand.u32 15, %v51_v11  ;;  %v48_v32 = vld [vmem:[%s2702_s0 + $0x10] sm:$0xff]  ;;  %v49_v33 = vld [vmem:[%s2702_s0 + $0x18] sm:$0xff] }
   0x5   :  { %1824 = vmatprep.mubr.msk.bf16.mxu0 %vm135_vm0, %v120_v4  ;;  %1829 = vmatpush3.bf16.msra.mxu1 %v2056_v7  ;;  %v2060_v30 = vld [vmem:[%s2700_s4] sm:$0xff]   ;;  %v1950_v40 = vpack.i.bf16 %v49_v33, %v48_v32  ;;  %v47_v43 = vld [vmem:[%s2702_s0 + $0x8] sm:$0xff] }
   0x6   :  { %1825 = vmatmul.mubr.msk.bf16.vlgmr.msra.gmra.mxu0 %vm135_vm0, %v121_v6  ;;  %1830 = vmatprep.subr.bf16.mxu1 %v2057_v9  ;;  %v2286_v23 = vand.u32 15, %v53_v14  ;;  %vm103_vm2 = vcmp.ge.s32.totalorder %v2279_v18, 1  ;;  %v46_v42 = vld [vmem:[%s2702_s0] sm:$0xff]  ;;  %vm107_vm5 = vcmp.ge.s32.totalorder %v2279_v18, 2  ;;  %vm111_vm12 = vcmp.ge.s32.totalorder %v2279_v18, 4 }
   0x7   :  { %v1945_v45 = vpack.i.bf16 %v47_v43, %v46_v42 }
   0x8   :  { %vm105_vm3 = vcmp.ge.s32.totalorder %v2286_v23, 1  ;;  %vm109_vm6 = vcmp.ge.s32.totalorder %v2286_v23, 2  ;;  %vm113_vm11 = vcmp.ge.s32.totalorder %v2286_v23, 4 }
   0x9   :  { %1831 = vmatpush3.bf16.msra.mxu1 %v2057_v9 }
   0xa   :  { %1832 = vmatprep.subr.bf16.mxu1 %v2058_v16 }
   0xd   :  { %1833 = vmatpush3.bf16.msra.mxu1 %v2058_v16 }
   0xe   :  { %1834 = vmatprep.subr.bf16.mxu1 %v2059_v26 }
  0x11   :  { %1835 = vmatpush3.bf16.msra.mxu1 %v2059_v26 }
  0x12   :  { %1836 = vmatprep.subr.bf16.mxu1 %v2060_v30 }
  0x15   :  { %1837 = vmatpush3.bf16.msra.mxu1 %v2060_v30  ;;  %v1659_v30 = vld [vmem:[%s2703_s5] ss:$0 sm:$0xff] }
  0xc6   :  { %v1826_v10 = vpop.f32.mrf.mxu0 }
  0xc7   :  { %v2281_v19 = vadd.f32 %v1826_v10, %v1655_v12 }
  0xc8   :  { %v176_v13 = vpop.f32.mrf.mxu0 }
  0xc9   :  { %v2274_v15 = vadd.f32 %v1655_v12, %v176_v13  ;;  %v224_v28 = vrot.slane %v2281_v19, 7  ;;  %v199_v50 = vrot.slane %v2281_v19, 6 }
  0xca   :  { %v1827_v17 = vpop.f32.mrf.mxu0 }
  0xcb   :  { %v2283_v20 = vadd.f32 %v1827_v17, %v1655_v12  ;;  %v221_v21 = vrot.slane %v2274_v15, 7  ;;  %v196_v47 = vrot.slane %v2274_v15, 6 }
  0xcc   :  { %v179_v22 = vpop.f32.mrf.mxu0 }
  0xcd   :  { %v2288_v24 = vadd.f32 %v1655_v12, %v179_v22  ;;  %v1925_v25 = vpack.i.bf16 %v2283_v20, %v2281_v19  ;;  %v232_v27 = vsel %vm220_vm1, 0.0, %v221_v21  ;;  %v226_v31 = vrot.slane %v2283_v20, 7 }
  0xce   :  { %v241_v36 = vsel %vm103_vm2, %v232_v27, 0.0  ;;  %v201_v51 = vrot.slane %v2283_v20, 6  ;;  %v207_v53 = vsel %vm195_vm4, 0.0, %v196_v47 }
  0xcf   :  { %1926 = vrot.lane.b32.xlu1 %v1925_v25, %s2178_s20  ;;  %v222_v29 = vrot.slane %v2288_v24, 7  ;;  %v1930_v34 = vpack.i.bf16 %v2288_v24, %v2274_v15  ;;  %v227_v41 = vsel %vm220_vm1, %v224_v28, %v226_v31  ;;  %v197_v48 = vrot.slane %v2288_v24, 6 }
  0xd0   :  { %v216_v58 = vsel %vm107_vm5, %v207_v53, 0.0  ;;  %v202_v59 = vsel %vm195_vm4, %v199_v50, %v201_v51  ;;  %v2061_v51 = vld [vmem:[%s2704_s6] sm:$0xff]  }
  0xd1   :  { %v223_v35 = vsel %vm220_vm1, %v221_v21, %v222_v29  ;;  %v225_v37 = vsel %vm220_vm1, %v222_v29, %v224_v28  ;;  %v200_v54 = vsel %vm195_vm4, %v197_v48, %v199_v50  ;;  %v198_v61 = vsel %vm195_vm4, %v196_v47, %v197_v48  ;;  %1842 = vmatprep.subr.bf16.mxu0 %v2061_v51 }
  0xd2   :  { %v1935_v38 = vpack.i.bf16 %v223_v35, %v241_v36  ;;  %v243_v39 = vsel %vm105_vm3, %v225_v37, 0.0  ;;  %v218_v62 = vsel %vm109_vm6, %v200_v54, 0.0  ;;  %1843 = vmatpush3.bf16.msra.mxu0 %v2061_v51 }
  0xd3   :  { %1931 = vrot.lane.b32.xlu1 %v1930_v34, %s2178_s20  ;;  %v1940_v44 = vpack.i.bf16 %v227_v41, %v243_v39 }
  0xd4   :  { %1936 = vrot.lane.b32.xlu0 %v1935_v38, %s2179_s27 }
  0xd7   :  { %1951 = vrot.lane.b32.xlu1 %v1950_v40, %s2180_s13 }
  0xd8   :  { %1941 = vrot.lane.b32.xlu0 %v1940_v44, %s2179_s27 }
  0xdc   :  { %1946 = vrot.lane.b32.xlu0 %v1945_v45, %s2180_s13 }
 0x141   :  { %v1927_v46 = vpop.permute.xlu1 %1926 }
 0x142   :  { %v1929_v1 = vunpack.i.h.bf16 %v1927_v46  ;;  %v1928_v2 = vunpack.i.l.bf16 %v1927_v46 }
 0x145   :  { %v1932_v49 = vpop.permute.xlu1 %1931 }
 0x146   :  { %v1937_v52 = vpop.permute.xlu0 %1936  ;;  %v1934_v9 = vunpack.i.h.bf16 %v1932_v49  ;;  %v1933_v10 = vunpack.i.l.bf16 %v1932_v49 }
 0x147   :  { %v1939_v55 = vunpack.i.h.bf16 %v1937_v52  ;;  %v1938_v56 = vunpack.i.l.bf16 %v1937_v52 }
 0x149   :  { %v1952_v57 = vpop.permute.xlu1 %1951  ;;  %v289_v5 = vsel %vm135_vm0, %v216_v58, %v1938_v56  ;;  %v290_v6 = vsel %vm135_vm0, %v198_v61, %v1939_v55 }
 0x14a   :  { %v1942_v60 = vpop.permute.xlu0 %1941  ;;  %v2337_v3 = vunpack.i.h.bf16 %v1952_v57  ;;  %v2339_v4 = vunpack.i.l.bf16 %v1952_v57  ;;  %v294_v17 = vsel %vm293_vm7, %v289_v5, %v1933_v10  ;;  %v295_v21 = vsel %vm293_vm7, %v290_v6, %v1934_v9 }
 0x14b   :  { %v1944_v63 = vunpack.i.h.bf16 %v1942_v60  ;;  %v1943_v0 = vunpack.i.l.bf16 %v1942_v60 }
 0x14d   :  { %v292_v7 = vsel %vm135_vm0, %v202_v59, %v1944_v63  ;;  %v291_v8 = vsel %vm135_vm0, %v218_v62, %v1943_v0 }
 0x14e   :  { %v297_v11 = vsel %vm293_vm7, %v292_v7, %v1929_v1  ;;  %v296_v12 = vsel %vm293_vm7, %v291_v8, %v1928_v2  ;;  %v1947_v13 = vpop.permute.xlu0 %1946  ;;  %v1671_v7 = vld [vmem:[%s2705_s7] ss:$0 sm:$0xff] }
 0x14f   :  { %v2347_v14 = vunpack.i.h.bf16 %v1947_v13  ;;  %v2349_v16 = vunpack.i.l.bf16 %v1947_v13  ;;  %v301_v22 = vsel %vm298_vm8, %v296_v12, %v2339_v4  ;;  %v302_v25 = vsel %vm298_vm8, %v297_v11, %v2337_v3 }
 0x150   :  { %v314_v29 = vpack.c.bf16 %v302_v25, %v301_v22 }
 0x151   :  { %v299_v26 = vsel %vm298_vm8, %v294_v17, %v2349_v16  ;;  %v300_v27 = vsel %vm298_vm8, %v295_v21, %v2347_v14 }
 0x152   :  { %v313_v28 = vpack.c.bf16 %v300_v27, %v299_v26 }
 0x154   :  { %1838 = vmatprep.mubr.msk.bf16.mxu1 %vm352_vm9, %v313_v28 }
 0x155   :  { %1839 = vmatmul.mubr.msk.bf16.vlgmr.msra.gmra.mxu1 %vm352_vm9, %v314_v29 }
 0x215   :  { %v1840_v31 = vpop.f32.mrf.mxu1 }
 0x216   :  { %v402_v32 = vadd.f32 %v1840_v31, %v1659_v30 }
 0x217   :  { %v393_v33 = vpop.f32.mrf.mxu1 }
 0x218   :  { %v1669_v34 = vmul.f32 -1.442695, %v402_v32  ;;  %v394_v35 = vadd.f32 %v1659_v30, %v393_v33 }
 0x219   :  { %v1841_v36 = vpop.f32.mrf.mxu1 }
 0x21a   :  { %v1667_v37 = vmul.f32 -1.442695, %v394_v35  ;;  %v405_v38 = vadd.f32 %v1841_v36, %v1659_v30  ;;  %2082 = vpow2.f32 %v1669_v34 }
 0x21b   :  { %v396_v39 = vpop.f32.mrf.mxu1 }
 0x21c   :  { %2084 = vpow2.f32 %v1667_v37  ;;  %v1670_v40 = vmul.f32 -1.442695, %v405_v38  ;;  %v397_v41 = vadd.f32 %v1659_v30, %v396_v39 }
 0x21e   :  { %2086 = vpow2.f32 %v1670_v40  ;;  %v1668_v42 = vmul.f32 -1.442695, %v397_v41  ;;  %v2062_v40 = vld [vmem:[%s2700_s4 + $0x48] sm:$0xff]  }
 0x21f   :  { %1848 = vmatprep.subr.bf16.mxu0 %v2062_v40 }
 0x220   :  { %2088 = vpow2.f32 %v1668_v42 }
 0x227   :  { %v2083_v43 = vpop.eup %2082 }
 0x228   :  { %v426_v47 = vadd.f32 1.0, %v2083_v43  ;;  %v2063_v43 = vld [vmem:[%s2700_s4 + $0x40] sm:$0xff]  }
 0x229   :  { %v2085_v44 = vpop.eup %2084 }
 0x22a   :  { %v424_v45 = vadd.f32 1.0, %v2085_v44 }
 0x22b   :  { %v2087_v46 = vpop.eup %2086 }
 0x22c   :  { %2090 = vrcp.f32 %v424_v45  ;;  %v427_v49 = vadd.f32 1.0, %v2087_v46 }
 0x22d   :  { %v2089_v48 = vpop.eup %2088  ;;  %2092 = vrcp.f32 %v426_v47 }
 0x22e   :  { %v425_v50 = vadd.f32 1.0, %v2089_v48 }
 0x230   :  { %2094 = vrcp.f32 %v425_v50  ;;  %v2065_v50 = vld [vmem:[%s2700_s4 + $0x30] sm:$0xff]  }
 0x231   :  { %2096 = vrcp.f32 %v427_v49  ;;  %v2064_v49 = vld [vmem:[%s2700_s4 + $0x38] sm:$0xff]  }
 0x232   :  { %2098 = vtanh.f32 %v394_v35 }
 0x233   :  { %2100 = vtanh.f32 %v397_v41 }
 0x234   :  { %2102 = vtanh.f32 %v402_v32 }
 0x235   :  { %2104 = vtanh.f32 %v405_v38 }
 0x239   :  { %v2091_v52 = vpop.eup %2090 }
 0x23a   :  { %440 = vrot.lane.b32.xlu0 %v2091_v52, %s2181_s16  ;;  %v2093_v53 = vpop.eup %2092 }
 0x23d   :  { %v2095_v54 = vpop.eup %2094 }
 0x23e   :  { %442 = vrot.lane.b32.xlu1 %v2095_v54, %s2181_s16  ;;  %444 = vrot.lane.b32.xlu0 %v2093_v53, %s2181_s16  ;;  %v2097_v55 = vpop.eup %2096 }
 0x23f   :  { %v2099_v57 = vpop.eup %2098 }
 0x240   :  { %v2101_v58 = vpop.eup %2100 }
 0x241   :  { %v2103_v62 = vpop.eup %2102 }
 0x242   :  { %446 = vrot.lane.b32.xlu1 %v2097_v55, %s2181_s16  ;;  %532 = vrot.lane.b32.xlu0 %v2274_v15, %s2179_s27 }
 0x246   :  { %534 = vrot.lane.b32.xlu1 %v2288_v24, %s2179_s27  ;;  %536 = vrot.lane.b32.xlu0 %v2281_v19, %s2179_s27  ;;  %v2105_v24 = vpop.eup %2104 }
 0x24a   :  { %538 = vrot.lane.b32.xlu1 %v2283_v20, %s2179_s27 }
 0x2ac   :  { %v441_v56 = vpop.permute.xlu0 %440 }
 0x2ad   :  { %v452_v60 = vmul.f32 %v2099_v57, %v441_v56  ;;  %v2066_v56 = vld [vmem:[%s2700_s4 + $0x28] sm:$0xff]  }
 0x2b0   :  { %v443_v59 = vpop.permute.xlu1 %442  ;;  %v445_v15 = vpop.permute.xlu0 %444 }
 0x2b1   :  { %v453_v61 = vmul.f32 %v2101_v58, %v443_v59  ;;  %v454_v1 = vmul.f32 %v2103_v62, %v445_v15 }
 0x2b3   :  { %v458_v63 = vpack.c.bf16 %v453_v61, %v452_v60 }
 0x2b4   :  { %v447_v0 = vpop.permute.xlu1 %446  ;;  %v533_v2 = vpop.permute.xlu0 %532 }
 0x2b5   :  { %v455_v19 = vmul.f32 %v2105_v24, %v447_v0  ;;  %1844 = vmatprep.mubr.msk.bf16.mxu0 %vm135_vm0, %v458_v63 }
 0x2b7   :  { %v459_v20 = vpack.c.bf16 %v455_v19, %v454_v1 }
 0x2b8   :  { %v535_v5 = vpop.permute.xlu1 %534  ;;  %v537_v12 = vpop.permute.xlu0 %536 }
 0x2b9   :  { %1845 = vmatmul.mubr.msk.bf16.vlgmr.msra.gmra.mxu0 %vm135_vm0, %v459_v20 }
 0x2ba   :  { %1849 = vmatpush3.bf16.msra.mxu0 %v2062_v40 }
 0x2bb   :  { %1850 = vmatprep.subr.bf16.mxu0 %v2063_v43 }
 0x2bc   :  { %v539_v17 = vpop.permute.xlu1 %538 }
 0x2be   :  { %1851 = vmatpush3.bf16.msra.mxu0 %v2063_v43 }
 0x2bf   :  { %1852 = vmatprep.subr.bf16.mxu0 %v2064_v49 }
 0x2c2   :  { %1853 = vmatpush3.bf16.msra.mxu0 %v2064_v49 }
 0x2c3   :  { %1854 = vmatprep.subr.bf16.mxu0 %v2065_v50 }
 0x2c6   :  { %1855 = vmatpush3.bf16.msra.mxu0 %v2065_v50  ;;  %v1686_v50 = vld [vmem:[%s2703_s5 + $0x1] ss:$0 sm:$0xff] }
 0x2c7   :  { %1856 = vmatprep.subr.bf16.mxu0 %v2066_v56 }
 0x2ca   :  { %1857 = vmatpush3.bf16.msra.mxu0 %v2066_v56 }
 0x379   :  { %v1846_v6 = vpop.f32.mrf.mxu0 }
 0x37a   :  { %v2386_v9 = vadd.f32 %v1846_v6, %v1671_v7 }
 0x37b   :  { %v513_v8 = vpop.f32.mrf.mxu0 }
 0x37c   :  { %v2388_v10 = vadd.f32 %v1671_v7, %v513_v8  ;;  %v2393_v22 = vadd.f32 %v537_v12, %v2386_v9 }
 0x37d   :  { %v1847_v11 = vpop.f32.mrf.mxu0 }
 0x37e   :  { %v2390_v13 = vadd.f32 %v1847_v11, %v1671_v7  ;;  %v2396_v25 = vadd.f32 %v533_v2, %v2388_v10  ;;  %v588_v31 = vrot.slane %v2393_v22, 6  ;;  %v556_v34 = vrot.slane %v2393_v22, 4 }
 0x37f   :  { %v516_v21 = vpop.f32.mrf.mxu0 }
 0x380   :  { %v2399_v26 = vadd.f32 %v539_v17, %v2390_v13  ;;  %v2401_v27 = vadd.f32 %v1671_v7, %v516_v21  ;;  %v585_v32 = vrot.slane %v2396_v25, 6  ;;  %v553_v35 = vrot.slane %v2396_v25, 4 }
 0x382   :  { %v2404_v28 = vadd.f32 %v535_v5, %v2401_v27  ;;  %v590_v29 = vrot.slane %v2399_v26, 6  ;;  %v558_v39 = vrot.slane %v2399_v26, 4  ;;  %v1990_v62 = vpack.i.bf16 %v2399_v26, %v2393_v22 }
 0x384   :  { %v586_v30 = vrot.slane %v2404_v28, 6  ;;  %v554_v33 = vrot.slane %v2404_v28, 4  ;;  %v591_v37 = vsel %vm195_vm4, %v588_v31, %v590_v29  ;;  %v559_v46 = vsel %vm552_vm10, %v556_v34, %v558_v39 }
 0x385   :  { %v1980_v63 = vpack.i.bf16 %v2404_v28, %v2396_v25 }
 0x386   :  { %v589_v36 = vsel %vm195_vm4, %v586_v30, %v588_v31  ;;  %v587_v38 = vsel %vm195_vm4, %v585_v32, %v586_v30  ;;  %v557_v44 = vsel %vm552_vm10, %v554_v33, %v556_v34  ;;  %v555_v45 = vsel %vm552_vm10, %v553_v35, %v554_v33 }
 0x387   :  { %v1960_v41 = vpack.i.bf16 %v591_v37, %v589_v36  ;;  %v1955_v42 = vpack.i.bf16 %v587_v38, %v585_v32  ;;  %v1970_v47 = vpack.i.bf16 %v559_v46, %v557_v44  ;;  %v1965_v48 = vpack.i.bf16 %v555_v45, %v553_v35 }
 0x389   :  { %1961 = vrot.lane.b32.xlu1 %v1960_v41, %s2181_s16  ;;  %1956 = vrot.lane.b32.xlu0 %v1955_v42, %s2181_s16 }
 0x38d   :  { %1971 = vrot.lane.b32.xlu1 %v1970_v47, %s2181_s16  ;;  %1966 = vrot.lane.b32.xlu0 %v1965_v48, %s2181_s16 }
 0x3fb   :  { %v1962_v51 = vpop.permute.xlu1 %1961  ;;  %v1957_v52 = vpop.permute.xlu0 %1956 }
 0x3fc   :  { %v1964_v53 = vunpack.i.h.bf16 %v1962_v51  ;;  %v1963_v54 = vunpack.i.l.bf16 %v1962_v51  ;;  %v1958_v55 = vunpack.i.l.bf16 %v1957_v52  ;;  %v1959_v58 = vunpack.i.h.bf16 %v1957_v52 }
 0x3fe   :  { %v607_v57 = vsel %vm109_vm6, %v1963_v54, 0.0  ;;  %v604_v59 = vsel %vm195_vm4, 0.0, %v1958_v55 }
 0x3ff   :  { %v1985_v60 = vpack.i.bf16 %v1964_v53, %v607_v57  ;;  %v605_v61 = vsel %vm107_vm5, %v604_v59, 0.0  ;;  %v1967_v24 = vpop.permute.xlu0 %1966  ;;  %v1972_v0 = vpop.permute.xlu1 %1971 }
 0x400   :  { %v1975_v15 = vpack.i.bf16 %v1959_v58, %v605_v61  ;;  %v1968_v1 = vunpack.i.l.bf16 %v1967_v24  ;;  %v1973_v20 = vunpack.i.l.bf16 %v1972_v0  ;;  %v1974_v12 = vunpack.i.h.bf16 %v1972_v0 }
 0x401   :  { %1986 = vrot.lane.b32.xlu1 %v1985_v60, %s2179_s27  ;;  %v1969_v17 = vunpack.i.h.bf16 %v1967_v24 }
 0x402   :  { %1976 = vrot.lane.b32.xlu0 %v1975_v15, %s2179_s27  ;;  %v572_v5 = vsel %vm552_vm10, 0.0, %v1968_v1  ;;  %v583_v29 = vsel %vm113_vm11, %v1973_v20, 0.0  ;;  %v2067_v20 = vld [vmem:[%s2704_s6 + $0x8] sm:$0xff]  }
 0x403   :  { %v581_v30 = vsel %vm111_vm12, %v572_v5, 0.0  ;;  %1862 = vmatprep.subr.bf16.mxu1 %v2067_v20 }
 0x404   :  { %1863 = vmatpush3.bf16.msra.mxu1 %v2067_v20 }
 0x405   :  { %1991 = vrot.lane.b32.xlu1 %v1990_v62, %s2179_s27 }
 0x406   :  { %1981 = vrot.lane.b32.xlu0 %v1980_v63, %s2179_s27 }
 0x473   :  { %v1987_v19 = vpop.permute.xlu1 %1986 }
 0x474   :  { %v1977_v2 = vpop.permute.xlu0 %1976  ;;  %v1989_v6 = vunpack.i.h.bf16 %v1987_v19  ;;  %v1988_v7 = vunpack.i.l.bf16 %v1987_v19 }
 0x475   :  { %v1979_v8 = vunpack.i.h.bf16 %v1977_v2  ;;  %v1978_v11 = vunpack.i.l.bf16 %v1977_v2 }
 0x476   :  { %v639_v34 = vsel %vm135_vm0, %v583_v29, %v1988_v7  ;;  %v640_v35 = vsel %vm135_vm0, %v1974_v12, %v1989_v6 }
 0x477   :  { %v1992_v21 = vpop.permute.xlu1 %1991  ;;  %v637_v38 = vsel %vm135_vm0, %v581_v30, %v1978_v11  ;;  %v638_v39 = vsel %vm135_vm0, %v1969_v17, %v1979_v8 }
 0x478   :  { %v1994_v31 = vunpack.i.h.bf16 %v1992_v21  ;;  %v1993_v32 = vunpack.i.l.bf16 %v1992_v21  ;;  %v1982_v33 = vpop.permute.xlu0 %1981 }
 0x479   :  { %v1984_v36 = vunpack.i.h.bf16 %v1982_v33  ;;  %v1983_v37 = vunpack.i.l.bf16 %v1982_v33 }
 0x47a   :  { %v643_v40 = vsel %vm293_vm7, %v639_v34, %v1993_v32  ;;  %v644_v41 = vsel %vm293_vm7, %v640_v35, %v1994_v31 }
 0x47b   :  { %v647_v42 = vsel %vm298_vm8, %v643_v40, %v2339_v4  ;;  %v648_v43 = vsel %vm298_vm8, %v644_v41, %v2337_v3  ;;  %v641_v44 = vsel %vm293_vm7, %v637_v38, %v1983_v37  ;;  %v642_v45 = vsel %vm293_vm7, %v638_v39, %v1984_v36  ;;  %v1701_v41 = vld [vmem:[%s2705_s7 + $0x1] ss:$0 sm:$0xff] }
 0x47c   :  { %v645_v46 = vsel %vm298_vm8, %v641_v44, %v2349_v16  ;;  %v646_v47 = vsel %vm298_vm8, %v642_v45, %v2347_v14  ;;  %v661_v49 = vpack.c.bf16 %v648_v43, %v647_v42 }
 0x47d   :  { %v660_v48 = vpack.c.bf16 %v646_v47, %v645_v46 }
 0x47f   :  { %1858 = vmatprep.mubr.msk.bf16.mxu0 %vm352_vm9, %v660_v48 }
 0x480   :  { %1859 = vmatmul.mubr.msk.bf16.vlgmr.msra.gmra.mxu0 %vm352_vm9, %v661_v49 }
 0x540   :  { %v1860_v51 = vpop.f32.mrf.mxu0 }
 0x541   :  { %v749_v52 = vadd.f32 %v1860_v51, %v1686_v50 }
 0x542   :  { %v740_v53 = vpop.f32.mrf.mxu0 }
 0x543   :  { %v1696_v54 = vmul.f32 -1.442695, %v749_v52  ;;  %v741_v55 = vadd.f32 %v1686_v50, %v740_v53 }
 0x544   :  { %v1861_v56 = vpop.f32.mrf.mxu0 }
 0x545   :  { %v1694_v57 = vmul.f32 -1.442695, %v741_v55  ;;  %v752_v58 = vadd.f32 %v1861_v56, %v1686_v50  ;;  %2106 = vpow2.f32 %v1696_v54 }
 0x546   :  { %v743_v59 = vpop.f32.mrf.mxu0 }
 0x547   :  { %2108 = vpow2.f32 %v1694_v57  ;;  %v1697_v60 = vmul.f32 -1.442695, %v752_v58  ;;  %v744_v61 = vadd.f32 %v1686_v50, %v743_v59  ;;  %v2068_v57 = vld [vmem:[%s2700_s4 + $0x70] sm:$0xff]  }
 0x548   :  { %1868 = vmatprep.subr.bf16.mxu1 %v2068_v57 }
 0x549   :  { %v1695_v15 = vmul.f32 -1.442695, %v744_v61  ;;  %2110 = vpow2.f32 %v1697_v60 }
 0x54b   :  { %2112 = vpow2.f32 %v1695_v15  ;;  %v2071_v15 = vld [vmem:[%s2700_s4 + $0x58] sm:$0xff]  }
 0x552   :  { %v2107_v62 = vpop.eup %2106 }
 0x553   :  { %v773_v0 = vadd.f32 1.0, %v2107_v62 }
 0x554   :  { %v2109_v63 = vpop.eup %2108 }
 0x555   :  { %v771_v24 = vadd.f32 1.0, %v2109_v63 }
 0x556   :  { %v2111_v1 = vpop.eup %2110 }
 0x557   :  { %2114 = vrcp.f32 %v771_v24  ;;  %v774_v5 = vadd.f32 1.0, %v2111_v1 }
 0x558   :  { %v2113_v19 = vpop.eup %2112  ;;  %2116 = vrcp.f32 %v773_v0 }
 0x559   :  { %v772_v2 = vadd.f32 1.0, %v2113_v19  ;;  %v2072_v19 = vld [vmem:[%s2700_s4 + $0x50] sm:$0xff]  }
 0x55b   :  { %2118 = vrcp.f32 %v772_v2 }
 0x55c   :  { %2120 = vrcp.f32 %v774_v5 }
 0x55d   :  { %2122 = vtanh.f32 %v741_v55 }
 0x55e   :  { %2124 = vtanh.f32 %v744_v61  ;;  %v2070_v61 = vld [vmem:[%s2700_s4 + $0x60] sm:$0xff]  }
 0x55f   :  { %2126 = vtanh.f32 %v749_v52 }
 0x560   :  { %2128 = vtanh.f32 %v752_v58 }
 0x564   :  { %v2115_v6 = vpop.eup %2114 }
 0x565   :  { %787 = vrot.lane.b32.xlu0 %v2115_v6, %s2181_s16  ;;  %v2117_v7 = vpop.eup %2116 }
 0x568   :  { %v2119_v8 = vpop.eup %2118 }
 0x569   :  { %789 = vrot.lane.b32.xlu1 %v2119_v8, %s2181_s16  ;;  %791 = vrot.lane.b32.xlu0 %v2117_v7, %s2181_s16  ;;  %v2121_v11 = vpop.eup %2120 }
 0x56a   :  { %v2123_v17 = vpop.eup %2122 }
 0x56b   :  { %v2125_v21 = vpop.eup %2124 }
 0x56c   :  { %v2127_v33 = vpop.eup %2126 }
 0x56d   :  { %793 = vrot.lane.b32.xlu1 %v2121_v11, %s2181_s16  ;;  %v2129_v35 = vpop.eup %2128 }
 0x5d7   :  { %v788_v12 = vpop.permute.xlu0 %787 }
 0x5d8   :  { %v799_v30 = vmul.f32 %v2123_v17, %v788_v12 }
 0x5db   :  { %v790_v29 = vpop.permute.xlu1 %789  ;;  %v792_v32 = vpop.permute.xlu0 %791 }
 0x5dc   :  { %v800_v31 = vmul.f32 %v2125_v21, %v790_v29  ;;  %v801_v37 = vmul.f32 %v2127_v33, %v792_v32 }
 0x5de   :  { %v806_v34 = vpack.c.bf16 %v800_v31, %v799_v30 }
 0x5df   :  { %v794_v36 = vpop.permute.xlu1 %793 }
 0x5e0   :  { %v802_v38 = vmul.f32 %v2129_v35, %v794_v36  ;;  %1864 = vmatprep.mubr.msk.bf16.mxu1 %vm135_vm0, %v806_v34 }
 0x5e2   :  { %v807_v39 = vpack.c.bf16 %v802_v38, %v801_v37 }
 0x5e4   :  { %1865 = vmatmul.mubr.msk.bf16.vlgmr.msra.gmra.mxu1 %vm135_vm0, %v807_v39 }
 0x5e5   :  { %1869 = vmatpush3.bf16.msra.mxu1 %v2068_v57 }
 0x6a4   :  { %v1866_v40 = vpop.f32.mrf.mxu1 }
 0x6a5   :  { %v2492_v43 = vadd.f32 %v1866_v40, %v1701_v41 }
 0x6a6   :  { %v862_v42 = vpop.f32.mrf.mxu1 }
 0x6a7   :  { %v2494_v44 = vadd.f32 %v1701_v41, %v862_v42  ;;  %v2500_v48 = vadd.f32 %v2492_v43, %v2393_v22 }
 0x6a8   :  { %v1867_v45 = vpop.f32.mrf.mxu1 }
 0x6a9   :  { %v2496_v46 = vadd.f32 %v1867_v45, %v1701_v41  ;;  %v2504_v49 = vadd.f32 %v2494_v44, %v2396_v25  ;;  %v910_v22 = vrot.slane %v2500_v48, 4 }
 0x6aa   :  { %v865_v47 = vpop.f32.mrf.mxu1 }
 0x6ab   :  { %v2508_v50 = vadd.f32 %v2496_v46, %v2399_v26  ;;  %v2510_v51 = vadd.f32 %v1701_v41, %v865_v47  ;;  %v907_v55 = vrot.slane %v2504_v49, 4  ;;  %v2005_v60 = vpack.i.bf16 %v2500_v48, %v2504_v49 }
 0x6ad   :  { %v912_v52 = vrot.slane %v2508_v50, 4  ;;  %v2515_v53 = vadd.f32 %v2510_v51, %v2404_v28  ;;  %v2069_v28 = vld [vmem:[%s2700_s4 + $0x68] sm:$0xff]   ;;  %v2025_v11 = vpack.i.bf16 %v2508_v50, %v2500_v48 }
 0x6ae   :  { %1870 = vmatprep.subr.bf16.mxu1 %v2069_v28 }
 0x6af   :  { %v908_v54 = vrot.slane %v2515_v53, 4  ;;  %v913_v56 = vsel %vm552_vm10, %v910_v22, %v912_v52  ;;  %1871 = vmatpush3.bf16.msra.mxu1 %v2069_v28  ;;  %v2015_v23 = vpack.i.bf16 %v2515_v53, %v2504_v49 }
 0x6b0   :  { %1872 = vmatprep.subr.bf16.mxu1 %v2070_v61 }
 0x6b1   :  { %v911_v25 = vsel %vm552_vm10, %v908_v54, %v910_v22  ;;  %v909_v26 = vsel %vm552_vm10, %v907_v55, %v908_v54 }
 0x6b2   :  { %v2000_v58 = vpack.i.bf16 %v913_v56, %v911_v25  ;;  %v1995_v59 = vpack.i.bf16 %v909_v26, %v907_v55 }
 0x6b3   :  { %1873 = vmatpush3.bf16.msra.mxu1 %v2070_v61 }
 0x6b4   :  { %2001 = vrot.lane.b32.xlu1 %v2000_v58, %s2181_s16  ;;  %1996 = vrot.lane.b32.xlu0 %v1995_v59, %s2181_s16  ;;  %v1716_v59 = vld [vmem:[%s2703_s5 + $0x2] ss:$0 sm:$0xff] }
 0x6b5   :  { %1874 = vmatprep.subr.bf16.mxu1 %v2071_v15 }
 0x6b7   :  { %1875 = vmatpush3.bf16.msra.mxu1 %v2071_v15 }
 0x6b8   :  { %2006 = vrot.lane.b32.xlu0 %v2005_v60, %s2181_s16  ;;  %1876 = vmatprep.subr.bf16.mxu1 %v2072_v19 }
 0x6bb   :  { %1877 = vmatpush3.bf16.msra.mxu1 %v2072_v19 }
 0x726   :  { %v2002_v62 = vpop.permute.xlu1 %2001  ;;  %v1997_v63 = vpop.permute.xlu0 %1996 }
 0x727   :  { %v2004_v24 = vunpack.i.h.bf16 %v2002_v62  ;;  %v2003_v0 = vunpack.i.l.bf16 %v2002_v62  ;;  %v1998_v1 = vunpack.i.l.bf16 %v1997_v63  ;;  %v1999_v2 = vunpack.i.h.bf16 %v1997_v63 }
 0x729   :  { %v929_v20 = vsel %vm113_vm11, %v2003_v0, 0.0  ;;  %v926_v5 = vsel %vm552_vm10, 0.0, %v1998_v1 }
 0x72a   :  { %v2020_v6 = vpack.i.bf16 %v2004_v24, %v929_v20  ;;  %v927_v7 = vsel %vm111_vm12, %v926_v5, 0.0  ;;  %v2007_v12 = vpop.permute.xlu0 %2006 }
 0x72b   :  { %v2010_v8 = vpack.i.bf16 %v1999_v2, %v927_v7  ;;  %v2009_v32 = vunpack.i.h.bf16 %v2007_v12  ;;  %v2008_v34 = vunpack.i.l.bf16 %v2007_v12  ;;  %v2073_v12 = vld [vmem:[%s2704_s6 + $0x10] sm:$0xff]  }
 0x72c   :  { %2021 = vrot.lane.b32.xlu0 %v2020_v6, %s2179_s27  ;;  %1882 = vmatprep.subr.bf16.mxu0 %v2073_v12 }
 0x72d   :  { %2011 = vrot.lane.b32.xlu1 %v2010_v8, %s2179_s27  ;;  %1883 = vmatpush3.bf16.msra.mxu0 %v2073_v12 }
 0x730   :  { %2026 = vrot.lane.b32.xlu0 %v2025_v11, %s2179_s27 }
 0x731   :  { %2016 = vrot.lane.b32.xlu1 %v2015_v23, %s2179_s27 }
 0x79e   :  { %v2022_v17 = vpop.permute.xlu0 %2021 }
 0x79f   :  { %v2012_v18 = vpop.permute.xlu1 %2011  ;;  %v2024_v21 = vunpack.i.h.bf16 %v2022_v17  ;;  %v2023_v29 = vunpack.i.l.bf16 %v2022_v17 }
 0x7a0   :  { %v2014_v30 = vunpack.i.h.bf16 %v2012_v18  ;;  %v2013_v31 = vunpack.i.l.bf16 %v2012_v18 }
 0x7a1   :  { %v961_v38 = vsel %vm135_vm0, 0.0, %v2023_v29  ;;  %v962_v39 = vsel %vm135_vm0, %v2009_v32, %v2024_v21 }
 0x7a2   :  { %v2027_v33 = vpop.permute.xlu0 %2026  ;;  %v960_v42 = vsel %vm135_vm0, %v2008_v34, %v2014_v30  ;;  %v959_v45 = vsel %vm135_vm0, 0.0, %v2013_v31 }
 0x7a3   :  { %v2029_v35 = vunpack.i.h.bf16 %v2027_v33  ;;  %v2028_v36 = vunpack.i.l.bf16 %v2027_v33  ;;  %v2017_v37 = vpop.permute.xlu1 %2016 }
 0x7a4   :  { %v2019_v40 = vunpack.i.h.bf16 %v2017_v37  ;;  %v2018_v41 = vunpack.i.l.bf16 %v2017_v37 }
 0x7a5   :  { %v965_v47 = vsel %vm293_vm7, %v961_v38, %v2028_v36  ;;  %v966_v52 = vsel %vm293_vm7, %v962_v39, %v2029_v35 }
 0x7a6   :  { %v969_v54 = vsel %vm298_vm8, %v965_v47, %v2339_v4  ;;  %v970_v22 = vsel %vm298_vm8, %v966_v52, %v2337_v3  ;;  %v963_v55 = vsel %vm293_vm7, %v959_v45, %v2018_v41  ;;  %v964_v25 = vsel %vm293_vm7, %v960_v42, %v2019_v40 }
 0x7a7   :  { %v967_v56 = vsel %vm298_vm8, %v963_v55, %v2349_v16  ;;  %v968_v26 = vsel %vm298_vm8, %v964_v25, %v2347_v14  ;;  %v983_v58 = vpack.c.bf16 %v970_v22, %v969_v54  ;;  %v1731_v54 = vld [vmem:[%s2705_s7 + $0x2] ss:$0 sm:$0xff]  ;;  %v879_v55 = vadd.f32 %v2492_v43, %v2386_v9  ;;  %v2075_v9 = vld [vmem:[%s2700_s4 + $0x90] sm:$0xff]  }
 0x7a8   :  { %v982_v57 = vpack.c.bf16 %v968_v26, %v967_v56  ;;  %v877_v26 = vadd.f32 %v2494_v44, %v2388_v10 }
 0x7aa   :  { %1878 = vmatprep.mubr.msk.bf16.mxu1 %vm352_vm9, %v982_v57 }
 0x7ab   :  { %1879 = vmatmul.mubr.msk.bf16.vlgmr.msra.gmra.mxu1 %vm352_vm9, %v983_v58 }
 0x86b   :  { %v1880_v28 = vpop.f32.mrf.mxu1 }
 0x86c   :  { %v1071_v60 = vadd.f32 %v1880_v28, %v1716_v59 }
 0x86d   :  { %v1062_v61 = vpop.f32.mrf.mxu1 }
 0x86e   :  { %v1726_v15 = vmul.f32 -1.442695, %v1071_v60  ;;  %v1063_v62 = vadd.f32 %v1716_v59, %v1062_v61 }
 0x86f   :  { %v1881_v63 = vpop.f32.mrf.mxu1 }
 0x870   :  { %v1724_v24 = vmul.f32 -1.442695, %v1063_v62  ;;  %v1074_v0 = vadd.f32 %v1881_v63, %v1716_v59  ;;  %2130 = vpow2.f32 %v1726_v15  ;;  %v878_v15 = vadd.f32 %v2510_v51, %v2401_v27 }
 0x871   :  { %v1065_v1 = vpop.f32.mrf.mxu1 }
 0x872   :  { %2132 = vpow2.f32 %v1724_v24  ;;  %v1727_v19 = vmul.f32 -1.442695, %v1074_v0  ;;  %v1066_v20 = vadd.f32 %v1716_v59, %v1065_v1  ;;  %v880_v59 = vadd.f32 %v2496_v46, %v2390_v13  ;;  %v2078_v1 = vld [vmem:[%s2700_s4 + $0x78] sm:$0xff]  }
 0x874   :  { %v1725_v2 = vmul.f32 -1.442695, %v1066_v20  ;;  %2134 = vpow2.f32 %v1727_v19 }
 0x876   :  { %2136 = vpow2.f32 %v1725_v2  ;;  %v2182_v2 = vmov 0.0  }
 0x87d   :  { %v2131_v5 = vpop.eup %2130 }
 0x87e   :  { %v1095_v8 = vadd.f32 1.0, %v2131_v5 }
 0x87f   :  { %v2133_v6 = vpop.eup %2132 }
 0x880   :  { %v1093_v7 = vadd.f32 1.0, %v2133_v6 }
 0x881   :  { %v2135_v11 = vpop.eup %2134 }
 0x882   :  { %2138 = vrcp.f32 %v1093_v7  ;;  %v1096_v18 = vadd.f32 1.0, %v2135_v11 }
 0x883   :  { %v2137_v23 = vpop.eup %2136  ;;  %2140 = vrcp.f32 %v1095_v8 }
 0x884   :  { %v1094_v17 = vadd.f32 1.0, %v2137_v23 }
 0x886   :  { %2142 = vrcp.f32 %v1094_v17 }
 0x887   :  { %2144 = vrcp.f32 %v1096_v18 }
 0x888   :  { %2146 = vtanh.f32 %v1063_v62 }
 0x889   :  { %2148 = vtanh.f32 %v1066_v20 }
 0x88a   :  { %2150 = vtanh.f32 %v1071_v60  ;;  %v2074_v60 = vld [vmem:[%s2700_s4 + $0x98] sm:$0xff]  }
 0x88b   :  { %2152 = vtanh.f32 %v1074_v0  ;;  %1888 = vmatprep.subr.bf16.mxu0 %v2074_v60 }
 0x88f   :  { %v2139_v21 = vpop.eup %2138 }
 0x890   :  { %1109 = vrot.lane.b32.xlu1 %v2139_v21, %s2181_s16  ;;  %v2141_v29 = vpop.eup %2140 }
 0x893   :  { %v2143_v30 = vpop.eup %2142 }
 0x894   :  { %1111 = vrot.lane.b32.xlu0 %v2143_v30, %s2181_s16  ;;  %1113 = vrot.lane.b32.xlu1 %v2141_v29, %s2181_s16  ;;  %v2145_v31 = vpop.eup %2144 }
 0x895   :  { %v2147_v33 = vpop.eup %2146 }
 0x896   :  { %v2149_v34 = vpop.eup %2148 }
 0x897   :  { %v2151_v39 = vpop.eup %2150 }
 0x898   :  { %1115 = vrot.lane.b32.xlu0 %v2145_v31, %s2181_s16  ;;  %v2153_v41 = vpop.eup %2152 }
 0x902   :  { %v1110_v32 = vpop.permute.xlu1 %1109 }
 0x903   :  { %v1121_v36 = vmul.f32 %v2147_v33, %v1110_v32 }
 0x906   :  { %v1112_v35 = vpop.permute.xlu0 %1111  ;;  %v1114_v38 = vpop.permute.xlu1 %1113 }
 0x907   :  { %v1122_v37 = vmul.f32 %v2149_v34, %v1112_v35  ;;  %v1123_v45 = vmul.f32 %v2151_v39, %v1114_v38 }
 0x909   :  { %v1128_v40 = vpack.c.bf16 %v1122_v37, %v1121_v36 }
 0x90a   :  { %v1116_v42 = vpop.permute.xlu0 %1115 }
 0x90b   :  { %v1124_v47 = vmul.f32 %v2153_v41, %v1116_v42  ;;  %1884 = vmatprep.mubr.msk.bf16.mxu0 %vm135_vm0, %v1128_v40 }
 0x90d   :  { %v1129_v52 = vpack.c.bf16 %v1124_v47, %v1123_v45 }
 0x90f   :  { %1885 = vmatmul.mubr.msk.bf16.vlgmr.msra.gmra.mxu0 %vm135_vm0, %v1129_v52 }
 0x910   :  { %1889 = vmatpush3.bf16.msra.mxu0 %v2074_v60 }
 0x911   :  { %1890 = vmatprep.subr.bf16.mxu0 %v2075_v9 }
 0x914   :  { %1891 = vmatpush3.bf16.msra.mxu0 %v2075_v9 }
 0x9cf   :  { %v1886_v22 = vpop.f32.mrf.mxu0 }
 0x9d0   :  { %v1193_v25 = vadd.f32 %v1886_v22, %v1731_v54  ;;  %v1746_v22 = vld [vmem:[%s2703_s5 + $0x3] ss:$0 sm:$0xff] }
 0x9d1   :  { %v1184_v56 = vpop.f32.mrf.mxu0 }
 0x9d2   :  { %v2593_v57 = vadd.f32 %v1193_v25, %v879_v55  ;;  %v1185_v58 = vadd.f32 %v1731_v54, %v1184_v56  ;;  %v1205_v43 = vadd.f32 %v1193_v25, %v2500_v48  ;;  %v2076_v48 = vld [vmem:[%s2700_s4 + $0x88] sm:$0xff]  }
 0x9d3   :  { %v1887_v28 = vpop.f32.mrf.mxu0  ;;  %1892 = vmatprep.subr.bf16.mxu0 %v2076_v48 }
 0x9d4   :  { %v2604_v61 = vadd.f32 %v1185_v58, %v877_v26  ;;  %v1203_v10 = vadd.f32 %v1185_v58, %v2504_v49  ;;  %v1196_v44 = vadd.f32 %v1887_v28, %v1731_v54  ;;  %1893 = vmatpush3.bf16.msra.mxu0 %v2076_v48 }
 0x9d5   :  { %v1187_v13 = vpop.f32.mrf.mxu0 }
 0x9d6   :  { %v2609_v46 = vadd.f32 %v1196_v44, %v880_v59  ;;  %v1206_v62 = vadd.f32 %v1196_v44, %v2508_v50  ;;  %v1188_v63 = vadd.f32 %v1731_v54, %v1187_v13  ;;  %v2030_v24 = vpack.i.bf16 %v1205_v43, %v1203_v10  ;;  %v2077_v50 = vld [vmem:[%s2700_s4 + $0x80] sm:$0xff]  }
 0x9d7   :  { %1894 = vmatprep.subr.bf16.mxu0 %v2077_v50 }
 0x9d8   :  { %v2615_v0 = vadd.f32 %v1188_v63, %v878_v15  ;;  %v1204_v49 = vadd.f32 %v1188_v63, %v2515_v53  ;;  %2031 = vrot.lane.b32.xlu1 %v2030_v24, %s2181_s16  ;;  %v2050_v27 = vpack.i.bf16 %v1206_v62, %v1205_v43  ;;  %1895 = vmatpush3.bf16.msra.mxu0 %v2077_v50  ;;  %v2079_v62 = vld [vmem:[%s2704_s6 + $0x18] sm:$0xff]  }
 0x9d9   :  { %1896 = vmatprep.subr.bf16.mxu0 %v2078_v1  ;;  %1902 = vmatprep.subr.bf16.mxu1 %v2079_v62 }
 0x9da   :  { %v2045_v51 = vpack.i.bf16 %v1204_v49, %v1203_v10  ;;  %1903 = vmatpush3.bf16.msra.mxu1 %v2079_v62 }
 0x9dc   :  { %1897 = vmatpush3.bf16.msra.mxu0 %v2078_v1 }
 0xa4a   :  { %v2032_v19 = vpop.permute.xlu1 %2031 }
 0xa4b   :  { %v2034_v20 = vunpack.i.h.bf16 %v2032_v19  ;;  %v2033_v53 = vunpack.i.l.bf16 %v2032_v19 }
 0xa4d   :  { %v2035_v5 = vpack.i.bf16 %v2034_v20, %v2182_v2  ;;  %v2040_v6 = vpack.i.bf16 %v2033_v53, %v2182_v2 }
 0xa4f   :  { %2036 = vrot.lane.b32.xlu1 %v2035_v5, %s2179_s27  ;;  %2041 = vrot.lane.b32.xlu0 %v2040_v6, %s2179_s27 }
 0xa53   :  { %2051 = vrot.lane.b32.xlu1 %v2050_v27, %s2179_s27  ;;  %2046 = vrot.lane.b32.xlu0 %v2045_v51, %s2179_s27 }
 0xac1   :  { %v2037_v7 = vpop.permute.xlu1 %2036  ;;  %v2042_v8 = vpop.permute.xlu0 %2041 }
 0xac2   :  { %v2039_v11 = vunpack.i.h.bf16 %v2037_v7  ;;  %v2038_v23 = vunpack.i.l.bf16 %v2037_v7  ;;  %v2044_v12 = vunpack.i.h.bf16 %v2042_v8  ;;  %v2043_v17 = vunpack.i.l.bf16 %v2042_v8 }
 0xac4   :  { %v1254_v33 = vsel %vm135_vm0, 0.0, %v2039_v11  ;;  %v1253_v34 = vsel %vm135_vm0, 0.0, %v2038_v23  ;;  %v1252_v35 = vsel %vm135_vm0, 0.0, %v2044_v12  ;;  %v1251_v36 = vsel %vm135_vm0, 0.0, %v2043_v17 }
 0xac5   :  { %v2052_v18 = vpop.permute.xlu1 %2051  ;;  %v2047_v21 = vpop.permute.xlu0 %2046 }
 0xac6   :  { %v2054_v29 = vunpack.i.h.bf16 %v2052_v18  ;;  %v2053_v30 = vunpack.i.l.bf16 %v2052_v18  ;;  %v2049_v31 = vunpack.i.h.bf16 %v2047_v21  ;;  %v2048_v32 = vunpack.i.l.bf16 %v2047_v21  ;;  %v2080_v18 = vld [vmem:[%s2706_s8] sm:$0xff]  }
 0xac7   :  { %1908 = vmatprep.subr.bf16.mxu1 %v2080_v18  ;;  %v1761_v21 = vld [vmem:[%s2705_s7 + $0x3] ss:$0 sm:$0xff] }
 0xac8   :  { %v1257_v37 = vsel %vm293_vm7, %v1253_v34, %v2053_v30  ;;  %v1258_v38 = vsel %vm293_vm7, %v1254_v33, %v2054_v29  ;;  %v1255_v39 = vsel %vm293_vm7, %v1251_v36, %v2048_v32  ;;  %v1256_v40 = vsel %vm293_vm7, %v1252_v35, %v2049_v31 }
 0xac9   :  { %v1261_v41 = vsel %vm298_vm8, %v1257_v37, %v2339_v4  ;;  %v1262_v42 = vsel %vm298_vm8, %v1258_v38, %v2337_v3  ;;  %v1259_v45 = vsel %vm298_vm8, %v1255_v39, %v2349_v16  ;;  %v1260_v47 = vsel %vm298_vm8, %v1256_v40, %v2347_v14 }
 0xaca   :  { %v1275_v52 = vpack.c.bf16 %v1262_v42, %v1261_v41  ;;  %v1274_v54 = vpack.c.bf16 %v1260_v47, %v1259_v45 }
 0xacc   :  { %1898 = vmatprep.mubr.msk.bf16.mxu0 %vm352_vm9, %v1274_v54 }
 0xacd   :  { %1899 = vmatmul.mubr.msk.bf16.vlgmr.msra.gmra.mxu0 %vm352_vm9, %v1275_v52 }
 0xb8d   :  { %v1900_v4 = vpop.f32.mrf.mxu0 }
 0xb8e   :  { %v1363_v55 = vadd.f32 %v1900_v4, %v1746_v22 }
 0xb8f   :  { %v1354_v25 = vpop.f32.mrf.mxu0 }
 0xb90   :  { %v1756_v3 = vmul.f32 -1.442695, %v1363_v55  ;;  %v1355_v56 = vadd.f32 %v1746_v22, %v1354_v25 }
 0xb91   :  { %v1901_v26 = vpop.f32.mrf.mxu0 }
 0xb92   :  { %v1754_v16 = vmul.f32 -1.442695, %v1355_v56  ;;  %v1366_v58 = vadd.f32 %v1901_v26, %v1746_v22  ;;  %2154 = vpow2.f32 %v1756_v3 }
 0xb93   :  { %v1357_v14 = vpop.f32.mrf.mxu0 }
 0xb94   :  { %2156 = vpow2.f32 %v1754_v16  ;;  %v1757_v59 = vmul.f32 -1.442695, %v1366_v58  ;;  %v1358_v28 = vadd.f32 %v1746_v22, %v1357_v14 }
 0xb96   :  { %v1755_v60 = vmul.f32 -1.442695, %v1358_v28  ;;  %2158 = vpow2.f32 %v1757_v59 }
 0xb98   :  { %2160 = vpow2.f32 %v1755_v60  ;;  %v1769_v60 = vld [vmem:[%s2709_s11] ss:$0 sm:$0xff] }
 0xb9f   :  { %v2155_v9 = vpop.eup %2154 }
 0xba0   :  { %v1387_v44 = vadd.f32 1.0, %v2155_v9 }
 0xba1   :  { %v2157_v43 = vpop.eup %2156 }
 0xba2   :  { %v1385_v10 = vadd.f32 1.0, %v2157_v43 }
 0xba3   :  { %v2159_v15 = vpop.eup %2158 }
 0xba4   :  { %2162 = vrcp.f32 %v1385_v10  ;;  %v1388_v24 = vadd.f32 1.0, %v2159_v15 }
 0xba5   :  { %v2161_v13 = vpop.eup %2160  ;;  %2164 = vrcp.f32 %v1387_v44 }
 0xba6   :  { %v1386_v63 = vadd.f32 1.0, %v2161_v13 }
 0xba8   :  { %2166 = vrcp.f32 %v1386_v63 }
 0xba9   :  { %2168 = vrcp.f32 %v1388_v24 }
 0xbaa   :  { %2170 = vtanh.f32 %v1355_v56 }
 0xbab   :  { %2172 = vtanh.f32 %v1358_v28 }
 0xbac   :  { %2174 = vtanh.f32 %v1363_v55 }
 0xbad   :  { %2176 = vtanh.f32 %v1366_v58 }
 0xbb1   :  { %v2163_v48 = vpop.eup %2162 }
 0xbb2   :  { %1401 = vrot.lane.b32.xlu0 %v2163_v48, %s2181_s16  ;;  %v2165_v49 = vpop.eup %2164 }
 0xbb5   :  { %v2167_v27 = vpop.eup %2166 }
 0xbb6   :  { %1403 = vrot.lane.b32.xlu1 %v2167_v27, %s2181_s16  ;;  %1405 = vrot.lane.b32.xlu0 %v2165_v49, %s2181_s16  ;;  %v2169_v51 = vpop.eup %2168 }
 0xbb7   :  { %v2171_v1 = vpop.eup %2170 }
 0xbb8   :  { %v2173_v19 = vpop.eup %2172 }
 0xbb9   :  { %v2175_v6 = vpop.eup %2174 }
 0xbba   :  { %1407 = vrot.lane.b32.xlu1 %v2169_v51, %s2181_s16  ;;  %v2177_v8 = vpop.eup %2176 }
 0xc24   :  { %v1402_v50 = vpop.permute.xlu0 %1401 }
 0xc25   :  { %v1413_v53 = vmul.f32 %v2171_v1, %v1402_v50 }
 0xc28   :  { %v1404_v20 = vpop.permute.xlu1 %1403  ;;  %v1406_v5 = vpop.permute.xlu0 %1405 }
 0xc29   :  { %v1414_v2 = vmul.f32 %v2173_v19, %v1404_v20  ;;  %v1415_v23 = vmul.f32 %v2175_v6, %v1406_v5 }
 0xc2b   :  { %v1420_v7 = vpack.c.bf16 %v1414_v2, %v1413_v53 }
 0xc2c   :  { %v1408_v11 = vpop.permute.xlu1 %1407 }
 0xc2d   :  { %v1416_v12 = vmul.f32 %v2177_v8, %v1408_v11  ;;  %1904 = vmatprep.mubr.msk.bf16.mxu1 %vm135_vm0, %v1420_v7 }
 0xc2f   :  { %v1421_v17 = vpack.c.bf16 %v1416_v12, %v1415_v23 }
 0xc31   :  { %1905 = vmatmul.mubr.msk.bf16.vlgmr.msra.gmra.mxu1 %vm135_vm0, %v1421_v17 }
 0xc32   :  { %1909 = vmatpush3.bf16.msra.mxu1 %v2080_v18 }
 0xcf1   :  { %v1906_v29 = vpop.f32.mrf.mxu1 }
 0xcf2   :  { %v1485_v30 = vadd.f32 %v1906_v29, %v1761_v21 }
 0xcf3   :  { %v1476_v31 = vpop.f32.mrf.mxu1 }
 0xcf4   :  { %v1477_v32 = vadd.f32 %v1761_v21, %v1476_v31  ;;  %v1493_v34 = vadd.f32 %v1485_v30, %v2593_v57  ;;  %v2081_v57 = vld [vmem:[%s2707_s10] sm:$0xff]  }
 0xcf5   :  { %v1907_v33 = vpop.f32.mrf.mxu1  ;;  %1914 = vmatprep.subr.bf16.mxu0 %v2081_v57 }
 0xcf6   :  { %v1488_v35 = vadd.f32 %v1907_v33, %v1761_v21  ;;  %v1491_v37 = vadd.f32 %v1477_v32, %v2604_v61  ;;  %v1497_v40 = vmax.f32 %v1493_v34, 0.0  ;;  %1915 = vmatpush3.bf16.msra.mxu0 %v2081_v57 }
 0xcf7   :  { %v1479_v36 = vpop.f32.mrf.mxu1 }
 0xcf8   :  { %v1494_v38 = vadd.f32 %v1488_v35, %v2609_v46  ;;  %v1480_v39 = vadd.f32 %v1761_v21, %v1479_v36  ;;  %v1495_v45 = vmax.f32 %v1491_v37, 0.0 }
 0xcfa   :  { %v1498_v41 = vmax.f32 %v1494_v38, 0.0  ;;  %v1492_v42 = vadd.f32 %v1480_v39, %v2615_v0  ;;  %v1765_v0 = vld [vmem:[%s2708_s9] ss:$0 sm:$0xff] }
 0xcfc   :  { %v1502_v47 = vpack.c.bf16 %v1498_v41, %v1497_v40  ;;  %v1496_v52 = vmax.f32 %v1492_v42, 0.0 }
 0xcfe   :  { %v1501_v54 = vpack.c.bf16 %v1496_v52, %v1495_v45 }
 0xd00   :  { %1910 = vmatprep.mubr.msk.bf16.mxu1 %vm135_vm0, %v1501_v54 }
 0xd01   :  { %1911 = vmatmul.mubr.msk.bf16.vlgmr.msra.gmra.mxu1 %vm135_vm0, %v1502_v47 }
 0xdc1   :  { %v1912_v61 = vpop.f32.mrf.mxu1 }
 0xdc2   :  { %v1565_v25 = vadd.f32 %v1912_v61, %v1765_v0 }
 0xdc3   :  { %v1556_v46 = vpop.f32.mrf.mxu1 }
 0xdc4   :  { %v1557_v4 = vadd.f32 %v1765_v0, %v1556_v46  ;;  %v1573_v14 = vmax.f32 %v1565_v25, 0.0 }
 0xdc5   :  { %v1913_v22 = vpop.f32.mrf.mxu1 }
 0xdc6   :  { %v1568_v55 = vadd.f32 %v1913_v22, %v1765_v0  ;;  %v1571_v16 = vmax.f32 %v1557_v4, 0.0 }
 0xdc7   :  { %v1559_v3 = vpop.f32.mrf.mxu1 }
 0xdc8   :  { %v1560_v56 = vadd.f32 %v1765_v0, %v1559_v3  ;;  %v1574_v26 = vmax.f32 %v1568_v55, 0.0 }
 0xdca   :  { %v1572_v58 = vmax.f32 %v1560_v56, 0.0  ;;  %v1578_v28 = vpack.c.bf16 %v1574_v26, %v1573_v14 }
 0xdcc   :  { %v1577_v59 = vpack.c.bf16 %v1572_v58, %v1571_v16 }
 0xdce   :  { %1916 = vmatprep.mubr.msk.bf16.mxu0 %vm135_vm0, %v1577_v59 }
 0xdcf   :  { %1917 = vmatmul.mubr.msk.bf16.vlgmr.msra.gmra.mxu0 %vm135_vm0, %v1578_v28 }
 0xe8f   :  { %v1918_v9 = vpop.f32.mrf.mxu0 }
 0xe90   :  { %v1641_v43 = vadd.f32 %v1918_v9, %v1769_v60 }
 0xe91   :  { %v1632_v10 = vpop.f32.mrf.mxu0 }
 0xe92   :  { %1649 = vst.msk [vmem:[%s2710_s12 + $0x10] sm:$0xff] %vm135_vm0, %v1641_v43  ;;  %v1633_v44 = vadd.f32 %v1769_v60, %v1632_v10 }
 0xe93   :  { %v1919_v15 = vpop.f32.mrf.mxu0 }
 0xe94   :  { %1647 = vst.msk [vmem:[%s2710_s12] sm:$0xff] %vm135_vm0, %v1633_v44  ;;  %v1644_v13 = vadd.f32 %v1919_v15, %v1769_v60 }
 0xe95   :  { %v1635_v62 = vpop.f32.mrf.mxu0 }
 0xe96   :  { %1650 = vst.msk [vmem:[%s2710_s12 + $0x18] sm:$0xff] %vm135_vm0, %v1644_v13  ;;  %v1636_v63 = vadd.f32 %v1769_v60, %v1635_v62 }
 0xe98   :  { %1648 = vst.msk [vmem:[%s2710_s12 + $0x8] sm:$0xff] %vm135_vm0, %v1636_v63 }

</bundles_post_ra>
